<compile_context>
chip_gen: v5e
topology: v5e:2x2
jax: 0.10.0
libtpu: 0.0.40
codegen_flags: <defaults>
</compile_context>

<pallas_src>
import functools

import jax
import jax.numpy as jnp
import numpy as np
from jax import lax
from jax.experimental import pallas as pl
from jax.experimental.pallas import tpu as pltpu

KSIZE = 3      # conv kernel size
POOL = 2       # max-pool window / stride
NLAYERS = 4    # ConvPoolCascade depth
SUBL = 8       # sublane height everything is padded to


def fused_encoder_kernel(x_ref, m_ref, wb_ref, o_ref, *, nlayers, c_out):
    """All conv->pool->bias->ReLU blocks for one batch tile, fully VMEM/vreg resident.

    x_ref : (1, 8, L)         L = B_tile*T lanes, lane = b*T + t; rows >= 1 are 0
    m_ref : (2*nlayers, 8, L) f32 boundary masks (left, right) per layer
    wb_ref: (ncols, 8, 1)     packed weight columns then bias columns (see wrapper)
    o_ref : (1, 8, L)         rows >= c_out are 0
    """
    L = x_ref.shape[-1]
    n_wcols = nlayers * KSIZE * c_out        # bias columns start here

    a = x_ref[0]                             # (8, L): layer-0 activation (C_in=1 in row 0)
    s = 1                                    # current lane stride of valid samples
    c_in = 1
    for l in range(nlayers):                 # static unroll over layers
        lmask = m_ref[2 * l]                 # (8, L): 0 where t - s leaves the sample
        rmask = m_ref[2 * l + 1]             # (8, L): 0 where t + s leaves the sample

        # shifted taps via XLU lane rotation + zero masks (no padding copies)
        a_lft = pltpu.roll(a, s, axis=1) * lmask        # x[t - s]
        a_rgt = pltpu.roll(a, L - s, axis=1) * rmask    # x[t + s]
        taps = (a_lft, a, a_rgt)

        # Conv1d as K*c_in VPU broadcast FMAs (exact f32, no MXU round trips):
        #   z[o, t] = sum_{k,i} w[l, k, o, i] * tap_k[i, t]
        z = None
        for k in range(KSIZE):
            tk = taps[k]
            for i in range(c_in):
                col = wb_ref[(l * KSIZE + k) * c_out + i]      # (8, 1) weight column
                term = col * tk[i:i + 1, :]                    # (8,1)*(1,L) -> (8,L)
                z = term if z is None else z + term

        # MaxPool1d(2) as an in-place lane pair-max (valid data now at stride 2*s),
        # then bias + ReLU on the pooled (halved) set — they commute with max.
        p = jnp.maximum(z, pltpu.roll(z, L - s, axis=1))
        a = jnp.maximum(p + wb_ref[n_wcols + l], 0.0)
        s *= POOL
        c_in = c_out

    o_ref[0] = a.astype(o_ref.dtype)


def _num_batch_tiles(b_eff):
    """1 grid step on 1-TC chips (v5e/v6e); 2 CORE_PARALLEL steps on v7x."""
    try:
        kind = jax.devices()[0].device_kind.lower()
    except Exception:
        kind = ""
    is_v7x = ("v7" in kind) or ("7x" in kind)
    core_par = getattr(pltpu, "CORE_PARALLEL", None)
    if is_v7x and core_par is not None and b_eff % 2 == 0:
        return 2, (core_par,)
    return 1, ("arbitrary",)


@jax.jit
def cnn_separate_encoder(x, params):
    """x: (N, C, T); params: list of (w (C_out, C_in, K), b (C_out,)).

    Returns (N, C, C_out * T // 2**nlayers), matching CnnSeparateEncoder.forward.
    """
    N, C, T = x.shape
    nl = len(params)
    stride_out = POOL ** nl
    assert T % stride_out == 0, "T must be divisible by 2**nlayers"
    C_out = params[0][0].shape[0]
    T_out = T // stride_out

    B_eff = N * C                       # channels are encoded separately (in_channels = 1)
    G, dim_sem = _num_batch_tiles(B_eff)
    B_tile = B_eff // G
    L = B_tile * T                      # batch folded onto lanes: lane = b*T + t

    # --- layout plumbing (all fused under this jit) ---
    xs = x.astype(jnp.float32).reshape(G, 1, L)
    xs = jnp.pad(xs, ((0, 0), (0, SUBL - 1), (0, 0)))            # (G, 8, L)

    # per-layer conv boundary masks, pre-broadcast to full sublane height
    pos = np.arange(L, dtype=np.int64) % T
    masks = np.zeros((2 * nl, SUBL, L), np.float32)
    s = 1
    for l in range(nl):
        masks[2 * l, :] = pos >= s
        masks[2 * l + 1, :] = pos < T - s
        s *= POOL
    masks = jnp.asarray(masks)

    # pack every weight column and every bias into ONE (ncols, 8, 1) operand:
    #   column (l*K + k)*C_out + i  holds w_l[:, i, k] (zero padded to 8 rows)
    #   column nl*K*C_out + l       holds b_l          (zero padded to 8 rows)
    wcols = []
    for w, b in params:
        c_in = w.shape[1]
        wt = jnp.transpose(w, (2, 1, 0)).astype(jnp.float32)               # (K, c_in, C_out)
        wt = jnp.pad(wt, ((0, 0), (0, C_out - c_in), (0, SUBL - C_out)))   # (K, C_out, 8)
        wcols.append(wt.reshape(KSIZE * C_out, SUBL))
    bcols = [jnp.pad(b.astype(jnp.float32), (0, SUBL - C_out))[None, :] for _, b in params]
    wb = jnp.concatenate(wcols + bcols, axis=0)[:, :, None]                # (ncols, 8, 1)
    ncols = nl * KSIZE * C_out + nl

    out = pl.pallas_call(
        functools.partial(fused_encoder_kernel, nlayers=nl, c_out=C_out),
        out_shape=jax.ShapeDtypeStruct((G, SUBL, L), jnp.float32),
        grid_spec=pltpu.PrefetchScalarGridSpec(
            num_scalar_prefetch=0,
            grid=(G,),
            in_specs=[
                pl.BlockSpec((1, SUBL, L), lambda g: (g, 0, 0)),
                pl.BlockSpec((2 * nl, SUBL, L), lambda g: (0, 0, 0)),
                pl.BlockSpec((ncols, SUBL, 1), lambda g: (0, 0, 0)),
            ],
            out_specs=pl.BlockSpec((1, SUBL, L), lambda g: (g, 0, 0)),
        ),
        compiler_params=pltpu.CompilerParams(dimension_semantics=dim_sem),
    )(xs, masks, wb)

    # decimate the in-place-pooled lanes (stride 2**nl) and restore PyTorch layout.
    # TODO(synk): for large T / N*C, compact inside the kernel (one selection matmul)
    #             and add a lane tile; at this toy size these ops fuse under the jit.
    out = out[:, :C_out, :].reshape(G, C_out, B_tile, T)[:, :, :, ::stride_out]
    out = jnp.transpose(out, (0, 2, 1, 3)).reshape(N, C, C_out * T_out)
    return out


def init_params(key, out_channels, nlayers=NLAYERS):
    """Deterministic Conv1d params (PyTorch-default-style uniform init); layer 0 has in_channels=1."""
    params = []
    in_c = 1
    for _ in range(nlayers):
        key, kw, kb = jax.random.split(key, 3)
        bound = 1.0 / (in_c * KSIZE) ** 0.5
        w = jax.random.uniform(kw, (out_channels, in_c, KSIZE), jnp.float32, -bound, bound)
        b = jax.random.uniform(kb, (out_channels,), jnp.float32, -bound, bound)
        params.append((w, b))
        in_c = out_channels
    return params


def reference_encoder(x, params):
    """Pure-JAX reference (same semantics) for validation."""
    N, C, T = x.shape
    h = x.reshape(N * C, 1, T).astype(jnp.float32)
    for w, b in params:
        B, ci, t = h.shape
        co = w.shape[0]
        hp = jnp.pad(h, ((0, 0), (0, 0), (1, 1)))
        y = jnp.zeros((B, co, t), jnp.float32)
        for k in range(KSIZE):
            y = y + jnp.einsum('oi,bit->bot', w[:, :, k], hp[:, :, k:k + t],
                               precision=lax.Precision.HIGHEST)
        y = jnp.maximum(y + b[None, :, None], 0.0)
        y = jnp.max(y.reshape(B, co, t // POOL, POOL), axis=-1)
        h = y
    return h.reshape(N, C, -1)


if __name__ == "__main__":
    N, nchns, T, out_channels = 2, 4, 64, 5   # d_out = [4, (64 // 16) * 5] = [4, 20]

    key = jax.random.PRNGKey(0)
    key, kx = jax.random.split(key)
    x = jax.random.normal(kx, (N, nchns, T), jnp.float32)
    params = init_params(key, out_channels)

    out = cnn_separate_encoder(x, params)
    out = jax.block_until_ready(out)

    ref = reference_encoder(x, params)
    assert out.shape == (N, nchns, out_channels * (T // POOL ** NLAYERS)), out.shape
    err = jnp.max(jnp.abs(out - ref))
    assert jnp.allclose(out, ref, rtol=1e-5, atol=1e-5), f"max abs err {err}"

    print("KERNEL_OK")
</pallas_src>

<mosaic_0001>
module attributes {stable_mosaic.version = 11 : i64} {
  func.func @fused_encoder_kernel(%arg0: i32, %arg1: memref<1x8x512xf32, #tpu.memory_space<vmem>>, %arg2: memref<8x8x512xf32, #tpu.memory_space<vmem>>, %arg3: memref<64x8x1xf32, #tpu.memory_space<vmem>>, %arg4: memref<1x8x512xf32, #tpu.memory_space<vmem>>) attributes {dimension_semantics = [#tpu.dimension_semantics<arbitrary>], iteration_bounds = array<i64: 1>, scalar_prefetch = 0 : i64, scratch_operands = 0 : i64, tpu.core_type = #tpu.core_type<tc>, window_params = [{transform_indices = @transform_0, window_bounds = array<i64: 1, 8, 512>}, {pipeline_mode = #tpu.pipeline_mode<synchronous>, transform_indices = @transform_1, window_bounds = array<i64: 8, 8, 512>}, {pipeline_mode = #tpu.pipeline_mode<synchronous>, transform_indices = @transform_2, window_bounds = array<i64: 64, 8, 1>}, {transform_indices = @transform_3, window_bounds = array<i64: 1, 8, 512>}]} {
    %c0 = arith.constant 0 : index
    %c0_0 = arith.constant 0 : index
    %c0_1 = arith.constant 0 : index
    %0 = vector.load %arg1[%c0, %c0_0, %c0_1] : memref<1x8x512xf32, #tpu.memory_space<vmem>>, vector<1x8x512xf32>
    %1 = vector.shape_cast %0 : vector<1x8x512xf32> to vector<8x512xf32>
    %c0_2 = arith.constant 0 : index
    %c0_3 = arith.constant 0 : index
    %c0_4 = arith.constant 0 : index
    %2 = vector.load %arg2[%c0_2, %c0_3, %c0_4] : memref<8x8x512xf32, #tpu.memory_space<vmem>>, vector<1x8x512xf32>
    %3 = vector.shape_cast %2 : vector<1x8x512xf32> to vector<8x512xf32>
    %c1 = arith.constant 1 : index
    %c0_5 = arith.constant 0 : index
    %c0_6 = arith.constant 0 : index
    %4 = vector.load %arg2[%c1, %c0_5, %c0_6] : memref<8x8x512xf32, #tpu.memory_space<vmem>>, vector<1x8x512xf32>
    %5 = vector.shape_cast %4 : vector<1x8x512xf32> to vector<8x512xf32>
    %c1_i32 = arith.constant 1 : i32
    %6 = tpu.dynamic_rotate %1 by %c1_i32 dim 1 : vector<8x512xf32>, i32 -> vector<8x512xf32>
    %7 = arith.mulf %6, %3 : vector<8x512xf32>
    %c511_i32 = arith.constant 511 : i32
    %8 = tpu.dynamic_rotate %1 by %c511_i32 dim 1 : vector<8x512xf32>, i32 -> vector<8x512xf32>
    %9 = arith.mulf %8, %5 : vector<8x512xf32>
    %c0_7 = arith.constant 0 : index
    %c0_8 = arith.constant 0 : index
    %c0_9 = arith.constant 0 : index
    %10 = vector.load %arg3[%c0_7, %c0_8, %c0_9] : memref<64x8x1xf32, #tpu.memory_space<vmem>>, vector<1x8x1xf32>
    %11 = vector.shape_cast %10 : vector<1x8x1xf32> to vector<8x1xf32>
    %12 = vector.extract_strided_slice %7 {offsets = [0, 0], sizes = [1, 512], strides = [1, 1]} : vector<8x512xf32> to vector<1x512xf32>
    %13 = vector.broadcast %11 : vector<8x1xf32> to vector<8x512xf32>
    %14 = vector.broadcast %12 : vector<1x512xf32> to vector<8x512xf32>
    %15 = arith.mulf %13, %14 : vector<8x512xf32>
    %c5 = arith.constant 5 : index
    %c0_10 = arith.constant 0 : index
    %c0_11 = arith.constant 0 : index
    %16 = vector.load %arg3[%c5, %c0_10, %c0_11] : memref<64x8x1xf32, #tpu.memory_space<vmem>>, vector<1x8x1xf32>
    %17 = vector.shape_cast %16 : vector<1x8x1xf32> to vector<8x1xf32>
    %18 = vector.extract_strided_slice %1 {offsets = [0, 0], sizes = [1, 512], strides = [1, 1]} : vector<8x512xf32> to vector<1x512xf32>
    %19 = vector.broadcast %17 : vector<8x1xf32> to vector<8x512xf32>
    %20 = vector.broadcast %18 : vector<1x512xf32> to vector<8x512xf32>
    %21 = arith.mulf %19, %20 : vector<8x512xf32>
    %22 = arith.addf %15, %21 : vector<8x512xf32>
    %c10 = arith.constant 10 : index
    %c0_12 = arith.constant 0 : index
    %c0_13 = arith.constant 0 : index
    %23 = vector.load %arg3[%c10, %c0_12, %c0_13] : memref<64x8x1xf32, #tpu.memory_space<vmem>>, vector<1x8x1xf32>
    %24 = vector.shape_cast %23 : vector<1x8x1xf32> to vector<8x1xf32>
    %25 = vector.extract_strided_slice %9 {offsets = [0, 0], sizes = [1, 512], strides = [1, 1]} : vector<8x512xf32> to vector<1x512xf32>
    %26 = vector.broadcast %24 : vector<8x1xf32> to vector<8x512xf32>
    %27 = vector.broadcast %25 : vector<1x512xf32> to vector<8x512xf32>
    %28 = arith.mulf %26, %27 : vector<8x512xf32>
    %29 = arith.addf %22, %28 : vector<8x512xf32>
    %c511_i32_14 = arith.constant 511 : i32
    %30 = tpu.dynamic_rotate %29 by %c511_i32_14 dim 1 : vector<8x512xf32>, i32 -> vector<8x512xf32>
    %31 = arith.maximumf %29, %30 : vector<8x512xf32>
    %c60 = arith.constant 60 : index
    %c0_15 = arith.constant 0 : index
    %c0_16 = arith.constant 0 : index
    %32 = vector.load %arg3[%c60, %c0_15, %c0_16] : memref<64x8x1xf32, #tpu.memory_space<vmem>>, vector<1x8x1xf32>
    %33 = vector.shape_cast %32 : vector<1x8x1xf32> to vector<8x1xf32>
    %34 = vector.broadcast %33 : vector<8x1xf32> to vector<8x512xf32>
    %35 = arith.addf %31, %34 : vector<8x512xf32>
    %cst = arith.constant 0.000000e+00 : f32
    %36 = vector.broadcast %cst : f32 to vector<8x512xf32>
    %37 = arith.maximumf %35, %36 : vector<8x512xf32>
    %c2 = arith.constant 2 : index
    %c0_17 = arith.constant 0 : index
    %c0_18 = arith.constant 0 : index
    %38 = vector.load %arg2[%c2, %c0_17, %c0_18] : memref<8x8x512xf32, #tpu.memory_space<vmem>>, vector<1x8x512xf32>
    %39 = vector.shape_cast %38 : vector<1x8x512xf32> to vector<8x512xf32>
    %c3 = arith.constant 3 : index
    %c0_19 = arith.constant 0 : index
    %c0_20 = arith.constant 0 : index
    %40 = vector.load %arg2[%c3, %c0_19, %c0_20] : memref<8x8x512xf32, #tpu.memory_space<vmem>>, vector<1x8x512xf32>
    %41 = vector.shape_cast %40 : vector<1x8x512xf32> to vector<8x512xf32>
    %c2_i32 = arith.constant 2 : i32
    %42 = tpu.dynamic_rotate %37 by %c2_i32 dim 1 : vector<8x512xf32>, i32 -> vector<8x512xf32>
    %43 = arith.mulf %42, %39 : vector<8x512xf32>
    %c510_i32 = arith.constant 510 : i32
    %44 = tpu.dynamic_rotate %37 by %c510_i32 dim 1 : vector<8x512xf32>, i32 -> vector<8x512xf32>
    %45 = arith.mulf %44, %41 : vector<8x512xf32>
    %c15 = arith.constant 15 : index
    %c0_21 = arith.constant 0 : index
    %c0_22 = arith.constant 0 : index
    %46 = vector.load %arg3[%c15, %c0_21, %c0_22] : memref<64x8x1xf32, #tpu.memory_space<vmem>>, vector<1x8x1xf32>
    %47 = vector.shape_cast %46 : vector<1x8x1xf32> to vector<8x1xf32>
    %48 = vector.extract_strided_slice %43 {offsets = [0, 0], sizes = [1, 512], strides = [1, 1]} : vector<8x512xf32> to vector<1x512xf32>
    %49 = vector.broadcast %47 : vector<8x1xf32> to vector<8x512xf32>
    %50 = vector.broadcast %48 : vector<1x512xf32> to vector<8x512xf32>
    %51 = arith.mulf %49, %50 : vector<8x512xf32>
    %c16 = arith.constant 16 : index
    %c0_23 = arith.constant 0 : index
    %c0_24 = arith.constant 0 : index
    %52 = vector.load %arg3[%c16, %c0_23, %c0_24] : memref<64x8x1xf32, #tpu.memory_space<vmem>>, vector<1x8x1xf32>
    %53 = vector.shape_cast %52 : vector<1x8x1xf32> to vector<8x1xf32>
    %54 = vector.extract_strided_slice %43 {offsets = [1, 0], sizes = [1, 512], strides = [1, 1]} : vector<8x512xf32> to vector<1x512xf32>
    %55 = vector.broadcast %53 : vector<8x1xf32> to vector<8x512xf32>
    %56 = vector.broadcast %54 : vector<1x512xf32> to vector<8x512xf32>
    %57 = arith.mulf %55, %56 : vector<8x512xf32>
    %58 = arith.addf %51, %57 : vector<8x512xf32>
    %c17 = arith.constant 17 : index
    %c0_25 = arith.constant 0 : index
    %c0_26 = arith.constant 0 : index
    %59 = vector.load %arg3[%c17, %c0_25, %c0_26] : memref<64x8x1xf32, #tpu.memory_space<vmem>>, vector<1x8x1xf32>
    %60 = vector.shape_cast %59 : vector<1x8x1xf32> to vector<8x1xf32>
    %61 = vector.extract_strided_slice %43 {offsets = [2, 0], sizes = [1, 512], strides = [1, 1]} : vector<8x512xf32> to vector<1x512xf32>
    %62 = vector.broadcast %60 : vector<8x1xf32> to vector<8x512xf32>
    %63 = vector.broadcast %61 : vector<1x512xf32> to vector<8x512xf32>
    %64 = arith.mulf %62, %63 : vector<8x512xf32>
    %65 = arith.addf %58, %64 : vector<8x512xf32>
    %c18 = arith.constant 18 : index
    %c0_27 = arith.constant 0 : index
    %c0_28 = arith.constant 0 : index
    %66 = vector.load %arg3[%c18, %c0_27, %c0_28] : memref<64x8x1xf32, #tpu.memory_space<vmem>>, vector<1x8x1xf32>
    %67 = vector.shape_cast %66 : vector<1x8x1xf32> to vector<8x1xf32>
    %68 = vector.extract_strided_slice %43 {offsets = [3, 0], sizes = [1, 512], strides = [1, 1]} : vector<8x512xf32> to vector<1x512xf32>
    %69 = vector.broadcast %67 : vector<8x1xf32> to vector<8x512xf32>
    %70 = vector.broadcast %68 : vector<1x512xf32> to vector<8x512xf32>
    %71 = arith.mulf %69, %70 : vector<8x512xf32>
    %72 = arith.addf %65, %71 : vector<8x512xf32>
    %c19 = arith.constant 19 : index
    %c0_29 = arith.constant 0 : index
    %c0_30 = arith.constant 0 : index
    %73 = vector.load %arg3[%c19, %c0_29, %c0_30] : memref<64x8x1xf32, #tpu.memory_space<vmem>>, vector<1x8x1xf32>
    %74 = vector.shape_cast %73 : vector<1x8x1xf32> to vector<8x1xf32>
    %75 = vector.extract_strided_slice %43 {offsets = [4, 0], sizes = [1, 512], strides = [1, 1]} : vector<8x512xf32> to vector<1x512xf32>
    %76 = vector.broadcast %74 : vector<8x1xf32> to vector<8x512xf32>
    %77 = vector.broadcast %75 : vector<1x512xf32> to vector<8x512xf32>
    %78 = arith.mulf %76, %77 : vector<8x512xf32>
    %79 = arith.addf %72, %78 : vector<8x512xf32>
    %c20 = arith.constant 20 : index
    %c0_31 = arith.constant 0 : index
    %c0_32 = arith.constant 0 : index
    %80 = vector.load %arg3[%c20, %c0_31, %c0_32] : memref<64x8x1xf32, #tpu.memory_space<vmem>>, vector<1x8x1xf32>
    %81 = vector.shape_cast %80 : vector<1x8x1xf32> to vector<8x1xf32>
    %82 = vector.extract_strided_slice %37 {offsets = [0, 0], sizes = [1, 512], strides = [1, 1]} : vector<8x512xf32> to vector<1x512xf32>
    %83 = vector.broadcast %81 : vector<8x1xf32> to vector<8x512xf32>
    %84 = vector.broadcast %82 : vector<1x512xf32> to vector<8x512xf32>
    %85 = arith.mulf %83, %84 : vector<8x512xf32>
    %86 = arith.addf %79, %85 : vector<8x512xf32>
    %c21 = arith.constant 21 : index
    %c0_33 = arith.constant 0 : index
    %c0_34 = arith.constant 0 : index
    %87 = vector.load %arg3[%c21, %c0_33, %c0_34] : memref<64x8x1xf32, #tpu.memory_space<vmem>>, vector<1x8x1xf32>
    %88 = vector.shape_cast %87 : vector<1x8x1xf32> to vector<8x1xf32>
    %89 = vector.extract_strided_slice %37 {offsets = [1, 0], sizes = [1, 512], strides = [1, 1]} : vector<8x512xf32> to vector<1x512xf32>
    %90 = vector.broadcast %88 : vector<8x1xf32> to vector<8x512xf32>
    %91 = vector.broadcast %89 : vector<1x512xf32> to vector<8x512xf32>
    %92 = arith.mulf %90, %91 : vector<8x512xf32>
    %93 = arith.addf %86, %92 : vector<8x512xf32>
    %c22 = arith.constant 22 : index
    %c0_35 = arith.constant 0 : index
    %c0_36 = arith.constant 0 : index
    %94 = vector.load %arg3[%c22, %c0_35, %c0_36] : memref<64x8x1xf32, #tpu.memory_space<vmem>>, vector<1x8x1xf32>
    %95 = vector.shape_cast %94 : vector<1x8x1xf32> to vector<8x1xf32>
    %96 = vector.extract_strided_slice %37 {offsets = [2, 0], sizes = [1, 512], strides = [1, 1]} : vector<8x512xf32> to vector<1x512xf32>
    %97 = vector.broadcast %95 : vector<8x1xf32> to vector<8x512xf32>
    %98 = vector.broadcast %96 : vector<1x512xf32> to vector<8x512xf32>
    %99 = arith.mulf %97, %98 : vector<8x512xf32>
    %100 = arith.addf %93, %99 : vector<8x512xf32>
    %c23 = arith.constant 23 : index
    %c0_37 = arith.constant 0 : index
    %c0_38 = arith.constant 0 : index
    %101 = vector.load %arg3[%c23, %c0_37, %c0_38] : memref<64x8x1xf32, #tpu.memory_space<vmem>>, vector<1x8x1xf32>
    %102 = vector.shape_cast %101 : vector<1x8x1xf32> to vector<8x1xf32>
    %103 = vector.extract_strided_slice %37 {offsets = [3, 0], sizes = [1, 512], strides = [1, 1]} : vector<8x512xf32> to vector<1x512xf32>
    %104 = vector.broadcast %102 : vector<8x1xf32> to vector<8x512xf32>
    %105 = vector.broadcast %103 : vector<1x512xf32> to vector<8x512xf32>
    %106 = arith.mulf %104, %105 : vector<8x512xf32>
    %107 = arith.addf %100, %106 : vector<8x512xf32>
    %c24 = arith.constant 24 : index
    %c0_39 = arith.constant 0 : index
    %c0_40 = arith.constant 0 : index
    %108 = vector.load %arg3[%c24, %c0_39, %c0_40] : memref<64x8x1xf32, #tpu.memory_space<vmem>>, vector<1x8x1xf32>
    %109 = vector.shape_cast %108 : vector<1x8x1xf32> to vector<8x1xf32>
    %110 = vector.extract_strided_slice %37 {offsets = [4, 0], sizes = [1, 512], strides = [1, 1]} : vector<8x512xf32> to vector<1x512xf32>
    %111 = vector.broadcast %109 : vector<8x1xf32> to vector<8x512xf32>
    %112 = vector.broadcast %110 : vector<1x512xf32> to vector<8x512xf32>
    %113 = arith.mulf %111, %112 : vector<8x512xf32>
    %114 = arith.addf %107, %113 : vector<8x512xf32>
    %c25 = arith.constant 25 : index
    %c0_41 = arith.constant 0 : index
    %c0_42 = arith.constant 0 : index
    %115 = vector.load %arg3[%c25, %c0_41, %c0_42] : memref<64x8x1xf32, #tpu.memory_space<vmem>>, vector<1x8x1xf32>
    %116 = vector.shape_cast %115 : vector<1x8x1xf32> to vector<8x1xf32>
    %117 = vector.extract_strided_slice %45 {offsets = [0, 0], sizes = [1, 512], strides = [1, 1]} : vector<8x512xf32> to vector<1x512xf32>
    %118 = vector.broadcast %116 : vector<8x1xf32> to vector<8x512xf32>
    %119 = vector.broadcast %117 : vector<1x512xf32> to vector<8x512xf32>
    %120 = arith.mulf %118, %119 : vector<8x512xf32>
    %121 = arith.addf %114, %120 : vector<8x512xf32>
    %c26 = arith.constant 26 : index
    %c0_43 = arith.constant 0 : index
    %c0_44 = arith.constant 0 : index
    %122 = vector.load %arg3[%c26, %c0_43, %c0_44] : memref<64x8x1xf32, #tpu.memory_space<vmem>>, vector<1x8x1xf32>
    %123 = vector.shape_cast %122 : vector<1x8x1xf32> to vector<8x1xf32>
    %124 = vector.extract_strided_slice %45 {offsets = [1, 0], sizes = [1, 512], strides = [1, 1]} : vector<8x512xf32> to vector<1x512xf32>
    %125 = vector.broadcast %123 : vector<8x1xf32> to vector<8x512xf32>
    %126 = vector.broadcast %124 : vector<1x512xf32> to vector<8x512xf32>
    %127 = arith.mulf %125, %126 : vector<8x512xf32>
    %128 = arith.addf %121, %127 : vector<8x512xf32>
    %c27 = arith.constant 27 : index
    %c0_45 = arith.constant 0 : index
    %c0_46 = arith.constant 0 : index
    %129 = vector.load %arg3[%c27, %c0_45, %c0_46] : memref<64x8x1xf32, #tpu.memory_space<vmem>>, vector<1x8x1xf32>
    %130 = vector.shape_cast %129 : vector<1x8x1xf32> to vector<8x1xf32>
    %131 = vector.extract_strided_slice %45 {offsets = [2, 0], sizes = [1, 512], strides = [1, 1]} : vector<8x512xf32> to vector<1x512xf32>
    %132 = vector.broadcast %130 : vector<8x1xf32> to vector<8x512xf32>
    %133 = vector.broadcast %131 : vector<1x512xf32> to vector<8x512xf32>
    %134 = arith.mulf %132, %133 : vector<8x512xf32>
    %135 = arith.addf %128, %134 : vector<8x512xf32>
    %c28 = arith.constant 28 : index
    %c0_47 = arith.constant 0 : index
    %c0_48 = arith.constant 0 : index
    %136 = vector.load %arg3[%c28, %c0_47, %c0_48] : memref<64x8x1xf32, #tpu.memory_space<vmem>>, vector<1x8x1xf32>
    %137 = vector.shape_cast %136 : vector<1x8x1xf32> to vector<8x1xf32>
    %138 = vector.extract_strided_slice %45 {offsets = [3, 0], sizes = [1, 512], strides = [1, 1]} : vector<8x512xf32> to vector<1x512xf32>
    %139 = vector.broadcast %137 : vector<8x1xf32> to vector<8x512xf32>
    %140 = vector.broadcast %138 : vector<1x512xf32> to vector<8x512xf32>
    %141 = arith.mulf %139, %140 : vector<8x512xf32>
    %142 = arith.addf %135, %141 : vector<8x512xf32>
    %c29 = arith.constant 29 : index
    %c0_49 = arith.constant 0 : index
    %c0_50 = arith.constant 0 : index
    %143 = vector.load %arg3[%c29, %c0_49, %c0_50] : memref<64x8x1xf32, #tpu.memory_space<vmem>>, vector<1x8x1xf32>
    %144 = vector.shape_cast %143 : vector<1x8x1xf32> to vector<8x1xf32>
    %145 = vector.extract_strided_slice %45 {offsets = [4, 0], sizes = [1, 512], strides = [1, 1]} : vector<8x512xf32> to vector<1x512xf32>
    %146 = vector.broadcast %144 : vector<8x1xf32> to vector<8x512xf32>
    %147 = vector.broadcast %145 : vector<1x512xf32> to vector<8x512xf32>
    %148 = arith.mulf %146, %147 : vector<8x512xf32>
    %149 = arith.addf %142, %148 : vector<8x512xf32>
    %c510_i32_51 = arith.constant 510 : i32
    %150 = tpu.dynamic_rotate %149 by %c510_i32_51 dim 1 : vector<8x512xf32>, i32 -> vector<8x512xf32>
    %151 = arith.maximumf %149, %150 : vector<8x512xf32>
    %c61 = arith.constant 61 : index
    %c0_52 = arith.constant 0 : index
    %c0_53 = arith.constant 0 : index
    %152 = vector.load %arg3[%c61, %c0_52, %c0_53] : memref<64x8x1xf32, #tpu.memory_space<vmem>>, vector<1x8x1xf32>
    %153 = vector.shape_cast %152 : vector<1x8x1xf32> to vector<8x1xf32>
    %154 = vector.broadcast %153 : vector<8x1xf32> to vector<8x512xf32>
    %155 = arith.addf %151, %154 : vector<8x512xf32>
    %cst_54 = arith.constant 0.000000e+00 : f32
    %156 = vector.broadcast %cst_54 : f32 to vector<8x512xf32>
    %157 = arith.maximumf %155, %156 : vector<8x512xf32>
    %c4 = arith.constant 4 : index
    %c0_55 = arith.constant 0 : index
    %c0_56 = arith.constant 0 : index
    %158 = vector.load %arg2[%c4, %c0_55, %c0_56] : memref<8x8x512xf32, #tpu.memory_space<vmem>>, vector<1x8x512xf32>
    %159 = vector.shape_cast %158 : vector<1x8x512xf32> to vector<8x512xf32>
    %c5_57 = arith.constant 5 : index
    %c0_58 = arith.constant 0 : index
    %c0_59 = arith.constant 0 : index
    %160 = vector.load %arg2[%c5_57, %c0_58, %c0_59] : memref<8x8x512xf32, #tpu.memory_space<vmem>>, vector<1x8x512xf32>
    %161 = vector.shape_cast %160 : vector<1x8x512xf32> to vector<8x512xf32>
    %c4_i32 = arith.constant 4 : i32
    %162 = tpu.dynamic_rotate %157 by %c4_i32 dim 1 : vector<8x512xf32>, i32 -> vector<8x512xf32>
    %163 = arith.mulf %162, %159 : vector<8x512xf32>
    %c508_i32 = arith.constant 508 : i32
    %164 = tpu.dynamic_rotate %157 by %c508_i32 dim 1 : vector<8x512xf32>, i32 -> vector<8x512xf32>
    %165 = arith.mulf %164, %161 : vector<8x512xf32>
    %c30 = arith.constant 30 : index
    %c0_60 = arith.constant 0 : index
    %c0_61 = arith.constant 0 : index
    %166 = vector.load %arg3[%c30, %c0_60, %c0_61] : memref<64x8x1xf32, #tpu.memory_space<vmem>>, vector<1x8x1xf32>
    %167 = vector.shape_cast %166 : vector<1x8x1xf32> to vector<8x1xf32>
    %168 = vector.extract_strided_slice %163 {offsets = [0, 0], sizes = [1, 512], strides = [1, 1]} : vector<8x512xf32> to vector<1x512xf32>
    %169 = vector.broadcast %167 : vector<8x1xf32> to vector<8x512xf32>
    %170 = vector.broadcast %168 : vector<1x512xf32> to vector<8x512xf32>
    %171 = arith.mulf %169, %170 : vector<8x512xf32>
    %c31 = arith.constant 31 : index
    %c0_62 = arith.constant 0 : index
    %c0_63 = arith.constant 0 : index
    %172 = vector.load %arg3[%c31, %c0_62, %c0_63] : memref<64x8x1xf32, #tpu.memory_space<vmem>>, vector<1x8x1xf32>
    %173 = vector.shape_cast %172 : vector<1x8x1xf32> to vector<8x1xf32>
    %174 = vector.extract_strided_slice %163 {offsets = [1, 0], sizes = [1, 512], strides = [1, 1]} : vector<8x512xf32> to vector<1x512xf32>
    %175 = vector.broadcast %173 : vector<8x1xf32> to vector<8x512xf32>
    %176 = vector.broadcast %174 : vector<1x512xf32> to vector<8x512xf32>
    %177 = arith.mulf %175, %176 : vector<8x512xf32>
    %178 = arith.addf %171, %177 : vector<8x512xf32>
    %c32 = arith.constant 32 : index
    %c0_64 = arith.constant 0 : index
    %c0_65 = arith.constant 0 : index
    %179 = vector.load %arg3[%c32, %c0_64, %c0_65] : memref<64x8x1xf32, #tpu.memory_space<vmem>>, vector<1x8x1xf32>
    %180 = vector.shape_cast %179 : vector<1x8x1xf32> to vector<8x1xf32>
    %181 = vector.extract_strided_slice %163 {offsets = [2, 0], sizes = [1, 512], strides = [1, 1]} : vector<8x512xf32> to vector<1x512xf32>
    %182 = vector.broadcast %180 : vector<8x1xf32> to vector<8x512xf32>
    %183 = vector.broadcast %181 : vector<1x512xf32> to vector<8x512xf32>
    %184 = arith.mulf %182, %183 : vector<8x512xf32>
    %185 = arith.addf %178, %184 : vector<8x512xf32>
    %c33 = arith.constant 33 : index
    %c0_66 = arith.constant 0 : index
    %c0_67 = arith.constant 0 : index
    %186 = vector.load %arg3[%c33, %c0_66, %c0_67] : memref<64x8x1xf32, #tpu.memory_space<vmem>>, vector<1x8x1xf32>
    %187 = vector.shape_cast %186 : vector<1x8x1xf32> to vector<8x1xf32>
    %188 = vector.extract_strided_slice %163 {offsets = [3, 0], sizes = [1, 512], strides = [1, 1]} : vector<8x512xf32> to vector<1x512xf32>
    %189 = vector.broadcast %187 : vector<8x1xf32> to vector<8x512xf32>
    %190 = vector.broadcast %188 : vector<1x512xf32> to vector<8x512xf32>
    %191 = arith.mulf %189, %190 : vector<8x512xf32>
    %192 = arith.addf %185, %191 : vector<8x512xf32>
    %c34 = arith.constant 34 : index
    %c0_68 = arith.constant 0 : index
    %c0_69 = arith.constant 0 : index
    %193 = vector.load %arg3[%c34, %c0_68, %c0_69] : memref<64x8x1xf32, #tpu.memory_space<vmem>>, vector<1x8x1xf32>
    %194 = vector.shape_cast %193 : vector<1x8x1xf32> to vector<8x1xf32>
    %195 = vector.extract_strided_slice %163 {offsets = [4, 0], sizes = [1, 512], strides = [1, 1]} : vector<8x512xf32> to vector<1x512xf32>
    %196 = vector.broadcast %194 : vector<8x1xf32> to vector<8x512xf32>
    %197 = vector.broadcast %195 : vector<1x512xf32> to vector<8x512xf32>
    %198 = arith.mulf %196, %197 : vector<8x512xf32>
    %199 = arith.addf %192, %198 : vector<8x512xf32>
    %c35 = arith.constant 35 : index
    %c0_70 = arith.constant 0 : index
    %c0_71 = arith.constant 0 : index
    %200 = vector.load %arg3[%c35, %c0_70, %c0_71] : memref<64x8x1xf32, #tpu.memory_space<vmem>>, vector<1x8x1xf32>
    %201 = vector.shape_cast %200 : vector<1x8x1xf32> to vector<8x1xf32>
    %202 = vector.extract_strided_slice %157 {offsets = [0, 0], sizes = [1, 512], strides = [1, 1]} : vector<8x512xf32> to vector<1x512xf32>
    %203 = vector.broadcast %201 : vector<8x1xf32> to vector<8x512xf32>
    %204 = vector.broadcast %202 : vector<1x512xf32> to vector<8x512xf32>
    %205 = arith.mulf %203, %204 : vector<8x512xf32>
    %206 = arith.addf %199, %205 : vector<8x512xf32>
    %c36 = arith.constant 36 : index
    %c0_72 = arith.constant 0 : index
    %c0_73 = arith.constant 0 : index
    %207 = vector.load %arg3[%c36, %c0_72, %c0_73] : memref<64x8x1xf32, #tpu.memory_space<vmem>>, vector<1x8x1xf32>
    %208 = vector.shape_cast %207 : vector<1x8x1xf32> to vector<8x1xf32>
    %209 = vector.extract_strided_slice %157 {offsets = [1, 0], sizes = [1, 512], strides = [1, 1]} : vector<8x512xf32> to vector<1x512xf32>
    %210 = vector.broadcast %208 : vector<8x1xf32> to vector<8x512xf32>
    %211 = vector.broadcast %209 : vector<1x512xf32> to vector<8x512xf32>
    %212 = arith.mulf %210, %211 : vector<8x512xf32>
    %213 = arith.addf %206, %212 : vector<8x512xf32>
    %c37 = arith.constant 37 : index
    %c0_74 = arith.constant 0 : index
    %c0_75 = arith.constant 0 : index
    %214 = vector.load %arg3[%c37, %c0_74, %c0_75] : memref<64x8x1xf32, #tpu.memory_space<vmem>>, vector<1x8x1xf32>
    %215 = vector.shape_cast %214 : vector<1x8x1xf32> to vector<8x1xf32>
    %216 = vector.extract_strided_slice %157 {offsets = [2, 0], sizes = [1, 512], strides = [1, 1]} : vector<8x512xf32> to vector<1x512xf32>
    %217 = vector.broadcast %215 : vector<8x1xf32> to vector<8x512xf32>
    %218 = vector.broadcast %216 : vector<1x512xf32> to vector<8x512xf32>
    %219 = arith.mulf %217, %218 : vector<8x512xf32>
    %220 = arith.addf %213, %219 : vector<8x512xf32>
    %c38 = arith.constant 38 : index
    %c0_76 = arith.constant 0 : index
    %c0_77 = arith.constant 0 : index
    %221 = vector.load %arg3[%c38, %c0_76, %c0_77] : memref<64x8x1xf32, #tpu.memory_space<vmem>>, vector<1x8x1xf32>
    %222 = vector.shape_cast %221 : vector<1x8x1xf32> to vector<8x1xf32>
    %223 = vector.extract_strided_slice %157 {offsets = [3, 0], sizes = [1, 512], strides = [1, 1]} : vector<8x512xf32> to vector<1x512xf32>
    %224 = vector.broadcast %222 : vector<8x1xf32> to vector<8x512xf32>
    %225 = vector.broadcast %223 : vector<1x512xf32> to vector<8x512xf32>
    %226 = arith.mulf %224, %225 : vector<8x512xf32>
    %227 = arith.addf %220, %226 : vector<8x512xf32>
    %c39 = arith.constant 39 : index
    %c0_78 = arith.constant 0 : index
    %c0_79 = arith.constant 0 : index
    %228 = vector.load %arg3[%c39, %c0_78, %c0_79] : memref<64x8x1xf32, #tpu.memory_space<vmem>>, vector<1x8x1xf32>
    %229 = vector.shape_cast %228 : vector<1x8x1xf32> to vector<8x1xf32>
    %230 = vector.extract_strided_slice %157 {offsets = [4, 0], sizes = [1, 512], strides = [1, 1]} : vector<8x512xf32> to vector<1x512xf32>
    %231 = vector.broadcast %229 : vector<8x1xf32> to vector<8x512xf32>
    %232 = vector.broadcast %230 : vector<1x512xf32> to vector<8x512xf32>
    %233 = arith.mulf %231, %232 : vector<8x512xf32>
    %234 = arith.addf %227, %233 : vector<8x512xf32>
    %c40 = arith.constant 40 : index
    %c0_80 = arith.constant 0 : index
    %c0_81 = arith.constant 0 : index
    %235 = vector.load %arg3[%c40, %c0_80, %c0_81] : memref<64x8x1xf32, #tpu.memory_space<vmem>>, vector<1x8x1xf32>
    %236 = vector.shape_cast %235 : vector<1x8x1xf32> to vector<8x1xf32>
    %237 = vector.extract_strided_slice %165 {offsets = [0, 0], sizes = [1, 512], strides = [1, 1]} : vector<8x512xf32> to vector<1x512xf32>
    %238 = vector.broadcast %236 : vector<8x1xf32> to vector<8x512xf32>
    %239 = vector.broadcast %237 : vector<1x512xf32> to vector<8x512xf32>
    %240 = arith.mulf %238, %239 : vector<8x512xf32>
    %241 = arith.addf %234, %240 : vector<8x512xf32>
    %c41 = arith.constant 41 : index
    %c0_82 = arith.constant 0 : index
    %c0_83 = arith.constant 0 : index
    %242 = vector.load %arg3[%c41, %c0_82, %c0_83] : memref<64x8x1xf32, #tpu.memory_space<vmem>>, vector<1x8x1xf32>
    %243 = vector.shape_cast %242 : vector<1x8x1xf32> to vector<8x1xf32>
    %244 = vector.extract_strided_slice %165 {offsets = [1, 0], sizes = [1, 512], strides = [1, 1]} : vector<8x512xf32> to vector<1x512xf32>
    %245 = vector.broadcast %243 : vector<8x1xf32> to vector<8x512xf32>
    %246 = vector.broadcast %244 : vector<1x512xf32> to vector<8x512xf32>
    %247 = arith.mulf %245, %246 : vector<8x512xf32>
    %248 = arith.addf %241, %247 : vector<8x512xf32>
    %c42 = arith.constant 42 : index
    %c0_84 = arith.constant 0 : index
    %c0_85 = arith.constant 0 : index
    %249 = vector.load %arg3[%c42, %c0_84, %c0_85] : memref<64x8x1xf32, #tpu.memory_space<vmem>>, vector<1x8x1xf32>
    %250 = vector.shape_cast %249 : vector<1x8x1xf32> to vector<8x1xf32>
    %251 = vector.extract_strided_slice %165 {offsets = [2, 0], sizes = [1, 512], strides = [1, 1]} : vector<8x512xf32> to vector<1x512xf32>
    %252 = vector.broadcast %250 : vector<8x1xf32> to vector<8x512xf32>
    %253 = vector.broadcast %251 : vector<1x512xf32> to vector<8x512xf32>
    %254 = arith.mulf %252, %253 : vector<8x512xf32>
    %255 = arith.addf %248, %254 : vector<8x512xf32>
    %c43 = arith.constant 43 : index
    %c0_86 = arith.constant 0 : index
    %c0_87 = arith.constant 0 : index
    %256 = vector.load %arg3[%c43, %c0_86, %c0_87] : memref<64x8x1xf32, #tpu.memory_space<vmem>>, vector<1x8x1xf32>
    %257 = vector.shape_cast %256 : vector<1x8x1xf32> to vector<8x1xf32>
    %258 = vector.extract_strided_slice %165 {offsets = [3, 0], sizes = [1, 512], strides = [1, 1]} : vector<8x512xf32> to vector<1x512xf32>
    %259 = vector.broadcast %257 : vector<8x1xf32> to vector<8x512xf32>
    %260 = vector.broadcast %258 : vector<1x512xf32> to vector<8x512xf32>
    %261 = arith.mulf %259, %260 : vector<8x512xf32>
    %262 = arith.addf %255, %261 : vector<8x512xf32>
    %c44 = arith.constant 44 : index
    %c0_88 = arith.constant 0 : index
    %c0_89 = arith.constant 0 : index
    %263 = vector.load %arg3[%c44, %c0_88, %c0_89] : memref<64x8x1xf32, #tpu.memory_space<vmem>>, vector<1x8x1xf32>
    %264 = vector.shape_cast %263 : vector<1x8x1xf32> to vector<8x1xf32>
    %265 = vector.extract_strided_slice %165 {offsets = [4, 0], sizes = [1, 512], strides = [1, 1]} : vector<8x512xf32> to vector<1x512xf32>
    %266 = vector.broadcast %264 : vector<8x1xf32> to vector<8x512xf32>
    %267 = vector.broadcast %265 : vector<1x512xf32> to vector<8x512xf32>
    %268 = arith.mulf %266, %267 : vector<8x512xf32>
    %269 = arith.addf %262, %268 : vector<8x512xf32>
    %c508_i32_90 = arith.constant 508 : i32
    %270 = tpu.dynamic_rotate %269 by %c508_i32_90 dim 1 : vector<8x512xf32>, i32 -> vector<8x512xf32>
    %271 = arith.maximumf %269, %270 : vector<8x512xf32>
    %c62 = arith.constant 62 : index
    %c0_91 = arith.constant 0 : index
    %c0_92 = arith.constant 0 : index
    %272 = vector.load %arg3[%c62, %c0_91, %c0_92] : memref<64x8x1xf32, #tpu.memory_space<vmem>>, vector<1x8x1xf32>
    %273 = vector.shape_cast %272 : vector<1x8x1xf32> to vector<8x1xf32>
    %274 = vector.broadcast %273 : vector<8x1xf32> to vector<8x512xf32>
    %275 = arith.addf %271, %274 : vector<8x512xf32>
    %cst_93 = arith.constant 0.000000e+00 : f32
    %276 = vector.broadcast %cst_93 : f32 to vector<8x512xf32>
    %277 = arith.maximumf %275, %276 : vector<8x512xf32>
    %c6 = arith.constant 6 : index
    %c0_94 = arith.constant 0 : index
    %c0_95 = arith.constant 0 : index
    %278 = vector.load %arg2[%c6, %c0_94, %c0_95] : memref<8x8x512xf32, #tpu.memory_space<vmem>>, vector<1x8x512xf32>
    %279 = vector.shape_cast %278 : vector<1x8x512xf32> to vector<8x512xf32>
    %c7 = arith.constant 7 : index
    %c0_96 = arith.constant 0 : index
    %c0_97 = arith.constant 0 : index
    %280 = vector.load %arg2[%c7, %c0_96, %c0_97] : memref<8x8x512xf32, #tpu.memory_space<vmem>>, vector<1x8x512xf32>
    %281 = vector.shape_cast %280 : vector<1x8x512xf32> to vector<8x512xf32>
    %c8_i32 = arith.constant 8 : i32
    %282 = tpu.dynamic_rotate %277 by %c8_i32 dim 1 : vector<8x512xf32>, i32 -> vector<8x512xf32>
    %283 = arith.mulf %282, %279 : vector<8x512xf32>
    %c504_i32 = arith.constant 504 : i32
    %284 = tpu.dynamic_rotate %277 by %c504_i32 dim 1 : vector<8x512xf32>, i32 -> vector<8x512xf32>
    %285 = arith.mulf %284, %281 : vector<8x512xf32>
    %c45 = arith.constant 45 : index
    %c0_98 = arith.constant 0 : index
    %c0_99 = arith.constant 0 : index
    %286 = vector.load %arg3[%c45, %c0_98, %c0_99] : memref<64x8x1xf32, #tpu.memory_space<vmem>>, vector<1x8x1xf32>
    %287 = vector.shape_cast %286 : vector<1x8x1xf32> to vector<8x1xf32>
    %288 = vector.extract_strided_slice %283 {offsets = [0, 0], sizes = [1, 512], strides = [1, 1]} : vector<8x512xf32> to vector<1x512xf32>
    %289 = vector.broadcast %287 : vector<8x1xf32> to vector<8x512xf32>
    %290 = vector.broadcast %288 : vector<1x512xf32> to vector<8x512xf32>
    %291 = arith.mulf %289, %290 : vector<8x512xf32>
    %c46 = arith.constant 46 : index
    %c0_100 = arith.constant 0 : index
    %c0_101 = arith.constant 0 : index
    %292 = vector.load %arg3[%c46, %c0_100, %c0_101] : memref<64x8x1xf32, #tpu.memory_space<vmem>>, vector<1x8x1xf32>
    %293 = vector.shape_cast %292 : vector<1x8x1xf32> to vector<8x1xf32>
    %294 = vector.extract_strided_slice %283 {offsets = [1, 0], sizes = [1, 512], strides = [1, 1]} : vector<8x512xf32> to vector<1x512xf32>
    %295 = vector.broadcast %293 : vector<8x1xf32> to vector<8x512xf32>
    %296 = vector.broadcast %294 : vector<1x512xf32> to vector<8x512xf32>
    %297 = arith.mulf %295, %296 : vector<8x512xf32>
    %298 = arith.addf %291, %297 : vector<8x512xf32>
    %c47 = arith.constant 47 : index
    %c0_102 = arith.constant 0 : index
    %c0_103 = arith.constant 0 : index
    %299 = vector.load %arg3[%c47, %c0_102, %c0_103] : memref<64x8x1xf32, #tpu.memory_space<vmem>>, vector<1x8x1xf32>
    %300 = vector.shape_cast %299 : vector<1x8x1xf32> to vector<8x1xf32>
    %301 = vector.extract_strided_slice %283 {offsets = [2, 0], sizes = [1, 512], strides = [1, 1]} : vector<8x512xf32> to vector<1x512xf32>
    %302 = vector.broadcast %300 : vector<8x1xf32> to vector<8x512xf32>
    %303 = vector.broadcast %301 : vector<1x512xf32> to vector<8x512xf32>
    %304 = arith.mulf %302, %303 : vector<8x512xf32>
    %305 = arith.addf %298, %304 : vector<8x512xf32>
    %c48 = arith.constant 48 : index
    %c0_104 = arith.constant 0 : index
    %c0_105 = arith.constant 0 : index
    %306 = vector.load %arg3[%c48, %c0_104, %c0_105] : memref<64x8x1xf32, #tpu.memory_space<vmem>>, vector<1x8x1xf32>
    %307 = vector.shape_cast %306 : vector<1x8x1xf32> to vector<8x1xf32>
    %308 = vector.extract_strided_slice %283 {offsets = [3, 0], sizes = [1, 512], strides = [1, 1]} : vector<8x512xf32> to vector<1x512xf32>
    %309 = vector.broadcast %307 : vector<8x1xf32> to vector<8x512xf32>
    %310 = vector.broadcast %308 : vector<1x512xf32> to vector<8x512xf32>
    %311 = arith.mulf %309, %310 : vector<8x512xf32>
    %312 = arith.addf %305, %311 : vector<8x512xf32>
    %c49 = arith.constant 49 : index
    %c0_106 = arith.constant 0 : index
    %c0_107 = arith.constant 0 : index
    %313 = vector.load %arg3[%c49, %c0_106, %c0_107] : memref<64x8x1xf32, #tpu.memory_space<vmem>>, vector<1x8x1xf32>
    %314 = vector.shape_cast %313 : vector<1x8x1xf32> to vector<8x1xf32>
    %315 = vector.extract_strided_slice %283 {offsets = [4, 0], sizes = [1, 512], strides = [1, 1]} : vector<8x512xf32> to vector<1x512xf32>
    %316 = vector.broadcast %314 : vector<8x1xf32> to vector<8x512xf32>
    %317 = vector.broadcast %315 : vector<1x512xf32> to vector<8x512xf32>
    %318 = arith.mulf %316, %317 : vector<8x512xf32>
    %319 = arith.addf %312, %318 : vector<8x512xf32>
    %c50 = arith.constant 50 : index
    %c0_108 = arith.constant 0 : index
    %c0_109 = arith.constant 0 : index
    %320 = vector.load %arg3[%c50, %c0_108, %c0_109] : memref<64x8x1xf32, #tpu.memory_space<vmem>>, vector<1x8x1xf32>
    %321 = vector.shape_cast %320 : vector<1x8x1xf32> to vector<8x1xf32>
    %322 = vector.extract_strided_slice %277 {offsets = [0, 0], sizes = [1, 512], strides = [1, 1]} : vector<8x512xf32> to vector<1x512xf32>
    %323 = vector.broadcast %321 : vector<8x1xf32> to vector<8x512xf32>
    %324 = vector.broadcast %322 : vector<1x512xf32> to vector<8x512xf32>
    %325 = arith.mulf %323, %324 : vector<8x512xf32>
    %326 = arith.addf %319, %325 : vector<8x512xf32>
    %c51 = arith.constant 51 : index
    %c0_110 = arith.constant 0 : index
    %c0_111 = arith.constant 0 : index
    %327 = vector.load %arg3[%c51, %c0_110, %c0_111] : memref<64x8x1xf32, #tpu.memory_space<vmem>>, vector<1x8x1xf32>
    %328 = vector.shape_cast %327 : vector<1x8x1xf32> to vector<8x1xf32>
    %329 = vector.extract_strided_slice %277 {offsets = [1, 0], sizes = [1, 512], strides = [1, 1]} : vector<8x512xf32> to vector<1x512xf32>
    %330 = vector.broadcast %328 : vector<8x1xf32> to vector<8x512xf32>
    %331 = vector.broadcast %329 : vector<1x512xf32> to vector<8x512xf32>
    %332 = arith.mulf %330, %331 : vector<8x512xf32>
    %333 = arith.addf %326, %332 : vector<8x512xf32>
    %c52 = arith.constant 52 : index
    %c0_112 = arith.constant 0 : index
    %c0_113 = arith.constant 0 : index
    %334 = vector.load %arg3[%c52, %c0_112, %c0_113] : memref<64x8x1xf32, #tpu.memory_space<vmem>>, vector<1x8x1xf32>
    %335 = vector.shape_cast %334 : vector<1x8x1xf32> to vector<8x1xf32>
    %336 = vector.extract_strided_slice %277 {offsets = [2, 0], sizes = [1, 512], strides = [1, 1]} : vector<8x512xf32> to vector<1x512xf32>
    %337 = vector.broadcast %335 : vector<8x1xf32> to vector<8x512xf32>
    %338 = vector.broadcast %336 : vector<1x512xf32> to vector<8x512xf32>
    %339 = arith.mulf %337, %338 : vector<8x512xf32>
    %340 = arith.addf %333, %339 : vector<8x512xf32>
    %c53 = arith.constant 53 : index
    %c0_114 = arith.constant 0 : index
    %c0_115 = arith.constant 0 : index
    %341 = vector.load %arg3[%c53, %c0_114, %c0_115] : memref<64x8x1xf32, #tpu.memory_space<vmem>>, vector<1x8x1xf32>
    %342 = vector.shape_cast %341 : vector<1x8x1xf32> to vector<8x1xf32>
    %343 = vector.extract_strided_slice %277 {offsets = [3, 0], sizes = [1, 512], strides = [1, 1]} : vector<8x512xf32> to vector<1x512xf32>
    %344 = vector.broadcast %342 : vector<8x1xf32> to vector<8x512xf32>
    %345 = vector.broadcast %343 : vector<1x512xf32> to vector<8x512xf32>
    %346 = arith.mulf %344, %345 : vector<8x512xf32>
    %347 = arith.addf %340, %346 : vector<8x512xf32>
    %c54 = arith.constant 54 : index
    %c0_116 = arith.constant 0 : index
    %c0_117 = arith.constant 0 : index
    %348 = vector.load %arg3[%c54, %c0_116, %c0_117] : memref<64x8x1xf32, #tpu.memory_space<vmem>>, vector<1x8x1xf32>
    %349 = vector.shape_cast %348 : vector<1x8x1xf32> to vector<8x1xf32>
    %350 = vector.extract_strided_slice %277 {offsets = [4, 0], sizes = [1, 512], strides = [1, 1]} : vector<8x512xf32> to vector<1x512xf32>
    %351 = vector.broadcast %349 : vector<8x1xf32> to vector<8x512xf32>
    %352 = vector.broadcast %350 : vector<1x512xf32> to vector<8x512xf32>
    %353 = arith.mulf %351, %352 : vector<8x512xf32>
    %354 = arith.addf %347, %353 : vector<8x512xf32>
    %c55 = arith.constant 55 : index
    %c0_118 = arith.constant 0 : index
    %c0_119 = arith.constant 0 : index
    %355 = vector.load %arg3[%c55, %c0_118, %c0_119] : memref<64x8x1xf32, #tpu.memory_space<vmem>>, vector<1x8x1xf32>
    %356 = vector.shape_cast %355 : vector<1x8x1xf32> to vector<8x1xf32>
    %357 = vector.extract_strided_slice %285 {offsets = [0, 0], sizes = [1, 512], strides = [1, 1]} : vector<8x512xf32> to vector<1x512xf32>
    %358 = vector.broadcast %356 : vector<8x1xf32> to vector<8x512xf32>
    %359 = vector.broadcast %357 : vector<1x512xf32> to vector<8x512xf32>
    %360 = arith.mulf %358, %359 : vector<8x512xf32>
    %361 = arith.addf %354, %360 : vector<8x512xf32>
    %c56 = arith.constant 56 : index
    %c0_120 = arith.constant 0 : index
    %c0_121 = arith.constant 0 : index
    %362 = vector.load %arg3[%c56, %c0_120, %c0_121] : memref<64x8x1xf32, #tpu.memory_space<vmem>>, vector<1x8x1xf32>
    %363 = vector.shape_cast %362 : vector<1x8x1xf32> to vector<8x1xf32>
    %364 = vector.extract_strided_slice %285 {offsets = [1, 0], sizes = [1, 512], strides = [1, 1]} : vector<8x512xf32> to vector<1x512xf32>
    %365 = vector.broadcast %363 : vector<8x1xf32> to vector<8x512xf32>
    %366 = vector.broadcast %364 : vector<1x512xf32> to vector<8x512xf32>
    %367 = arith.mulf %365, %366 : vector<8x512xf32>
    %368 = arith.addf %361, %367 : vector<8x512xf32>
    %c57 = arith.constant 57 : index
    %c0_122 = arith.constant 0 : index
    %c0_123 = arith.constant 0 : index
    %369 = vector.load %arg3[%c57, %c0_122, %c0_123] : memref<64x8x1xf32, #tpu.memory_space<vmem>>, vector<1x8x1xf32>
    %370 = vector.shape_cast %369 : vector<1x8x1xf32> to vector<8x1xf32>
    %371 = vector.extract_strided_slice %285 {offsets = [2, 0], sizes = [1, 512], strides = [1, 1]} : vector<8x512xf32> to vector<1x512xf32>
    %372 = vector.broadcast %370 : vector<8x1xf32> to vector<8x512xf32>
    %373 = vector.broadcast %371 : vector<1x512xf32> to vector<8x512xf32>
    %374 = arith.mulf %372, %373 : vector<8x512xf32>
    %375 = arith.addf %368, %374 : vector<8x512xf32>
    %c58 = arith.constant 58 : index
    %c0_124 = arith.constant 0 : index
    %c0_125 = arith.constant 0 : index
    %376 = vector.load %arg3[%c58, %c0_124, %c0_125] : memref<64x8x1xf32, #tpu.memory_space<vmem>>, vector<1x8x1xf32>
    %377 = vector.shape_cast %376 : vector<1x8x1xf32> to vector<8x1xf32>
    %378 = vector.extract_strided_slice %285 {offsets = [3, 0], sizes = [1, 512], strides = [1, 1]} : vector<8x512xf32> to vector<1x512xf32>
    %379 = vector.broadcast %377 : vector<8x1xf32> to vector<8x512xf32>
    %380 = vector.broadcast %378 : vector<1x512xf32> to vector<8x512xf32>
    %381 = arith.mulf %379, %380 : vector<8x512xf32>
    %382 = arith.addf %375, %381 : vector<8x512xf32>
    %c59 = arith.constant 59 : index
    %c0_126 = arith.constant 0 : index
    %c0_127 = arith.constant 0 : index
    %383 = vector.load %arg3[%c59, %c0_126, %c0_127] : memref<64x8x1xf32, #tpu.memory_space<vmem>>, vector<1x8x1xf32>
    %384 = vector.shape_cast %383 : vector<1x8x1xf32> to vector<8x1xf32>
    %385 = vector.extract_strided_slice %285 {offsets = [4, 0], sizes = [1, 512], strides = [1, 1]} : vector<8x512xf32> to vector<1x512xf32>
    %386 = vector.broadcast %384 : vector<8x1xf32> to vector<8x512xf32>
    %387 = vector.broadcast %385 : vector<1x512xf32> to vector<8x512xf32>
    %388 = arith.mulf %386, %387 : vector<8x512xf32>
    %389 = arith.addf %382, %388 : vector<8x512xf32>
    %c504_i32_128 = arith.constant 504 : i32
    %390 = tpu.dynamic_rotate %389 by %c504_i32_128 dim 1 : vector<8x512xf32>, i32 -> vector<8x512xf32>
    %391 = arith.maximumf %389, %390 : vector<8x512xf32>
    %c63 = arith.constant 63 : index
    %c0_129 = arith.constant 0 : index
    %c0_130 = arith.constant 0 : index
    %392 = vector.load %arg3[%c63, %c0_129, %c0_130] : memref<64x8x1xf32, #tpu.memory_space<vmem>>, vector<1x8x1xf32>
    %393 = vector.shape_cast %392 : vector<1x8x1xf32> to vector<8x1xf32>
    %394 = vector.broadcast %393 : vector<8x1xf32> to vector<8x512xf32>
    %395 = arith.addf %391, %394 : vector<8x512xf32>
    %cst_131 = arith.constant 0.000000e+00 : f32
    %396 = vector.broadcast %cst_131 : f32 to vector<8x512xf32>
    %397 = arith.maximumf %395, %396 : vector<8x512xf32>
    %c0_132 = arith.constant 0 : index
    %c0_133 = arith.constant 0 : index
    %c0_134 = arith.constant 0 : index
    %398 = vector.load %arg4[%c0_132, %c0_133, %c0_134] : memref<1x8x512xf32, #tpu.memory_space<vmem>>, vector<1x8x512xf32>
    %399 = vector.shape_cast %398 : vector<1x8x512xf32> to vector<8x512xf32>
    %400 = vector.shape_cast %397 : vector<8x512xf32> to vector<1x8x512xf32>
    tpu.vector_store %arg4[%c0_132, %c0_133, %c0_134], %400 {strides = array<i32>} : memref<1x8x512xf32, #tpu.memory_space<vmem>>, vector<1x8x512xf32>,
    return
  }
  func.func @transform_0(%arg0: i32) -> (i32, i32, i32) {
    %c0_i32 = arith.constant 0 : i32
    %c0_i32_0 = arith.constant 0 : i32
    %c0_i32_1 = arith.constant 0 : i32
    return %arg0, %c0_i32, %c0_i32_0 : i32, i32, i32
  }
  func.func @transform_1(%arg0: i32) -> (i32, i32, i32) {
    %c0_i32 = arith.constant 0 : i32
    %c0_i32_0 = arith.constant 0 : i32
    %c0_i32_1 = arith.constant 0 : i32
    %c0_i32_2 = arith.constant 0 : i32
    return %c0_i32, %c0_i32_0, %c0_i32_1 : i32, i32, i32
  }
  func.func @transform_2(%arg0: i32) -> (i32, i32, i32) {
    %c0_i32 = arith.constant 0 : i32
    %c0_i32_0 = arith.constant 0 : i32
    %c0_i32_1 = arith.constant 0 : i32
    %c0_i32_2 = arith.constant 0 : i32
    return %c0_i32, %c0_i32_0, %c0_i32_1 : i32, i32, i32
  }
  func.func @transform_3(%arg0: i32) -> (i32, i32, i32) {
    %c0_i32 = arith.constant 0 : i32
    %c0_i32_0 = arith.constant 0 : i32
    %c0_i32_1 = arith.constant 0 : i32
    return %arg0, %c0_i32, %c0_i32_0 : i32, i32, i32
  }
}

</mosaic_0001>

<bundles_post_ra>
// kernel: cnn_separate_encoder.1
= control target key start
LH: loop header
LB: loop body
LE: loop exit
PB: predicated region body
PF: predicated region fallthrough
CT: control target
= control target key end

     0   :  { %v1313_v2 = vmov 0   ;;  %s1314_s16 = smov 1   ;;  %s1315_s17 = smov 127   ;;  %v35_v11 = vlaneseq  ;;  %s2225_s0 = inlined_call_operand.vmem [shape: f32[1,8,512], index: 0, kind: input, shape index: {}]   ;;  %s2226_s2 = inlined_call_operand.vmem [shape: f32[64,8,1], index: 2, kind: input, shape index: {}]   ;;  %s2227_s1 = inlined_call_operand.vmem [shape: f32[8,8,512], index: 1, kind: input, shape index: {}]   ;;  %s2228_s3 = inlined_call_operand.vmem [shape: f32[1,8,512], index: 3, kind: output, shape index: {}]  }
   0x1   :  { %v1345_v0 = vld [vmem:[%s2225_s0 + $0x10] sm:$0xff]  ;;  %v1350_v1 = vld [vmem:[%s2225_s0] sm:$0xff]  ;;  %1312 = vset.pattern.permute.xlu1 %v1313_v2  ;;  %1311 = vset.pattern.permute.xlu0 %v1313_v2  ;;  %v1359_v3 = vld [vmem:[%s2225_s0 + $0x18] sm:$0xff]  ;;  %s1316_s29 = smov 2   ;;  %s1317_s9 = smov 126  }
   0x2   :  { %31 = vrot.lane.b32.xlu1 %v1345_v0, %s1314_s16  ;;  %27 = vrot.lane.b32.xlu0 %v1350_v1, %s1314_s16  ;;  %v1364_v4 = vld [vmem:[%s2225_s0 + $0x8] sm:$0xff]  ;;  %v63_v5 = vld [vmem:[%s2226_s2] sm:$0xff]  ;;  %v1383_v12 = vand.u32 127, %v35_v11  ;;  %v84_v40 = vperm.slane %v1350_v1, 0  ;;  %v87_v41 = vperm.slane %v1359_v3, 0  ;;  %v86_v57 = vperm.slane %v1345_v0, 0 }
   0x3   :  { %46 = vrot.lane.b32.xlu2 %v1350_v1, %s1315_s17  ;;  %v1227_v6 = vld [vmem:[%s2226_s2 + $0x50] sm:$0xff]  ;;  %v1226_v7 = vld [vmem:[%s2226_s2 + $0x28] sm:$0xff]  ;;  %v18_v16 = vld [vmem:[%s2227_s1] sm:$0xff]  ;;  %v85_v42 = vperm.slane %v1364_v4, 0  ;;  %s1318_s24 = smov 4   ;;  %s1319_s30 = smov 124  }
   0x4   :  { %1310 = vset.pattern.permute.xlu2 %v1313_v2  ;;  %vm37_vm0 = vcmp.lt.s32.totalorder %v1383_v12, 1  ;;  %vm54_vm1 = vcmp.lt.s32.totalorder %v1383_v12, 127  ;;  %v21_v17 = vld [vmem:[%s2227_s1 + $0x18] sm:$0xff]  ;;  %v19_v20 = vld [vmem:[%s2227_s1 + $0x8] sm:$0xff]  ;;  %v1222_v24 = vld [vmem:[%s2227_s1 + $0x20] sm:$0xff]  ;;  %vm164_vm2 = vcmp.lt.s32.totalorder %v1383_v12, 2 }
   0x5   :  { %v1223_v29 = vld [vmem:[%s2227_s1 + $0x28] sm:$0xff]  ;;  %v1225_v31 = vld [vmem:[%s2227_s1 + $0x38] sm:$0xff]  ;;  %v20_v37 = vld [vmem:[%s2227_s1 + $0x10] sm:$0xff]  ;;  %vm181_vm3 = vcmp.lt.s32.totalorder %v1383_v12, 126  ;;  %vm520_vm4 = vcmp.lt.s32.totalorder %v1383_v12, 4  ;;  %vm537_vm5 = vcmp.lt.s32.totalorder %v1383_v12, 124 }
   0x6   :  { %v1224_v61 = vld [vmem:[%s2227_s1 + $0x30] sm:$0xff]  ;;  %s1320_s20 = smov 8   ;;  %s1321_s23 = smov 120   ;;  %vm876_vm6 = vcmp.lt.s32.totalorder %v1383_v12, 8  ;;  %vm893_vm7 = vcmp.lt.s32.totalorder %v1383_v12, 120 }
   0xa   :  { %33 = vrot.lane.b32.xlu1 %v1359_v3, %s1314_s16  ;;  %29 = vrot.lane.b32.xlu0 %v1364_v4, %s1314_s16 }
   0xb   :  { %48 = vrot.lane.b32.xlu2 %v1364_v4, %s1315_s17 }
  0x12   :  { %52 = vrot.lane.b32.xlu1 %v1359_v3, %s1315_s17  ;;  %50 = vrot.lane.b32.xlu0 %v1345_v0, %s1315_s17 }
  0x13   :  { %66 = vperm.xlu2 %1310, %v63_v5  }
  0x1a   :  { %100 = vperm.xlu1 %1312, %v1227_v6   ;;  %81 = vperm.xlu0 %1311, %v1226_v7  }
  0x5d   :  { %v47_v10 = vpop.permute.xlu2 %46 }
  0x65   :  { %v49_v15 = vpop.permute.xlu2 %48 }
  0x66   :  { %v57_v25 = vsel %vm54_vm1, %v47_v10, %v49_v15 }
  0x67   :  { %v59_v33 = vmul.f32 %v1222_v24, %v57_v25 }
  0x69   :  { %v103_v45 = vperm.slane %v59_v33, 0 }
  0x6d   :  { %v67_v43 = vpop.permute.xlu2 %66 }
  0x74   :  { %v32_v8 = vpop.permute.xlu1 %31  ;;  %v28_v9 = vpop.permute.xlu0 %27 }
  0x7c   :  { %v34_v13 = vpop.permute.xlu1 %33  ;;  %v30_v14 = vpop.permute.xlu0 %29 }
  0x7d   :  { %v38_v18 = vsel %vm37_vm0, %v32_v8, %v34_v13  ;;  %v41_v19 = vsel %vm37_vm0, %v34_v13, %v28_v9  ;;  %v40_v21 = vsel %vm37_vm0, %v28_v9, %v30_v14  ;;  %v39_v34 = vsel %vm37_vm0, %v30_v14, %v32_v8  ;;  %v1239_v13 = vld [vmem:[%s2226_s2 + $0x88] sm:$0xff]  ;;  %v1228_v14 = vld [vmem:[%s2226_s2 + $0x1e0] sm:$0xff] }
  0x7e   :  { %v42_v26 = vmul.f32 %v41_v19, %v18_v16  ;;  %v45_v27 = vmul.f32 %v38_v18, %v21_v17  ;;  %v43_v28 = vmul.f32 %v40_v21, %v19_v20  ;;  %v44_v46 = vmul.f32 %v39_v34, %v20_v37  ;;  %v1242_v16 = vld [vmem:[%s2226_s2 + $0xa0] sm:$0xff]  ;;  %v1237_v17 = vld [vmem:[%s2226_s2 + $0x78] sm:$0xff]  ;;  %v1240_v19 = vld [vmem:[%s2226_s2 + $0x90] sm:$0xff] }
  0x7f   :  { %v1238_v18 = vld [vmem:[%s2226_s2 + $0x80] sm:$0xff]  ;;  %v1241_v20 = vld [vmem:[%s2226_s2 + $0x98] sm:$0xff] }
  0x80   :  { %v69_v35 = vperm.slane %v42_v26, 0  ;;  %v72_v36 = vperm.slane %v45_v27, 0  ;;  %v70_v38 = vperm.slane %v43_v28, 0  ;;  %v71_v3 = vperm.slane %v44_v46, 0  ;;  %v1248_v46 = vld [vmem:[%s2226_s2 + $0xd0] sm:$0xff] }
  0x82   :  { %v73_v49 = vmul.f32 %v69_v35, %v67_v43  ;;  %v74_v50 = vmul.f32 %v70_v38, %v67_v43  ;;  %v76_v51 = vmul.f32 %v72_v36, %v67_v43  ;;  %v75_v0 = vmul.f32 %v71_v3, %v67_v43  ;;  %v1243_v43 = vld [vmem:[%s2226_s2 + $0xa8] sm:$0xff] }
  0x84   :  { %v53_v22 = vpop.permute.xlu1 %52  ;;  %v51_v23 = vpop.permute.xlu0 %50 }
  0x85   :  { %v56_v30 = vsel %vm54_vm1, %v49_v15, %v51_v23  ;;  %v58_v32 = vsel %vm54_vm1, %v53_v22, %v47_v10  ;;  %v55_v58 = vsel %vm54_vm1, %v51_v23, %v53_v22 }
  0x86   :  { %v60_v39 = vmul.f32 %v1223_v29, %v56_v30  ;;  %v62_v44 = vmul.f32 %v1225_v31, %v58_v32  ;;  %v61_v7 = vmul.f32 %v1224_v61, %v55_v58 }
  0x88   :  { %v104_v52 = vperm.slane %v60_v39, 0  ;;  %v106_v53 = vperm.slane %v62_v44, 0  ;;  %v105_v9 = vperm.slane %v61_v7, 0  ;;  %v1244_v44 = vld [vmem:[%s2226_s2 + $0xb0] sm:$0xff] }
  0x8c   :  { %v101_v47 = vpop.permute.xlu1 %100  ;;  %v82_v48 = vpop.permute.xlu0 %81 }
  0x8d   :  { %v88_v54 = vmul.f32 %v84_v40, %v82_v48  ;;  %v89_v55 = vmul.f32 %v85_v42, %v82_v48  ;;  %v91_v56 = vmul.f32 %v87_v41, %v82_v48  ;;  %v107_v59 = vmul.f32 %v103_v45, %v101_v47  ;;  %v1245_v41 = vld [vmem:[%s2226_s2 + $0xb8] sm:$0xff]  ;;  %v1246_v45 = vld [vmem:[%s2226_s2 + $0xc0] sm:$0xff] }
  0x8e   :  { %v108_v60 = vmul.f32 %v104_v52, %v101_v47  ;;  %v110_v62 = vmul.f32 %v106_v53, %v101_v47  ;;  %v90_v8 = vmul.f32 %v86_v57, %v82_v48  ;;  %v109_v11 = vmul.f32 %v105_v9, %v101_v47  ;;  %v1247_v47 = vld [vmem:[%s2226_s2 + $0xc8] sm:$0xff]  ;;  %v1249_v48 = vld [vmem:[%s2226_s2 + $0xd8] sm:$0xff] }
  0x8f   :  { %v95_v63 = vadd.f32 %v91_v56, %v76_v51  ;;  %v93_v1 = vadd.f32 %v89_v55, %v74_v50  ;;  %v92_v2 = vadd.f32 %v88_v54, %v73_v49  ;;  %v1251_v49 = vld [vmem:[%s2226_s2 + $0xe8] sm:$0xff]  ;;  %v1250_v50 = vld [vmem:[%s2226_s2 + $0xe0] sm:$0xff] }
  0x90   :  { %v94_v10 = vadd.f32 %v90_v8, %v75_v0  ;;  %v1229_v56 = vld [vmem:[%s2227_s1 + $0x40] sm:$0xff] }
  0x91   :  { %v114_v4 = vadd.f32 %v110_v62, %v95_v63  ;;  %v112_v5 = vadd.f32 %v108_v60, %v93_v1  ;;  %v111_v6 = vadd.f32 %v107_v59, %v92_v2 }
  0x92   :  { %v113_v15 = vadd.f32 %v109_v11, %v94_v10 }
  0x93   :  { %121 = vrot.lane.b32.xlu0 %v114_v4, %s1315_s17  ;;  %117 = vrot.lane.b32.xlu1 %v112_v5, %s1315_s17 }
  0x94   :  { %115 = vrot.lane.b32.xlu2 %v111_v6, %s1315_s17 }
  0x9b   :  { %228 = vperm.xlu0 %1311, %v1239_v13   ;;  %135 = vperm.xlu1 %1312, %v1228_v14   ;;  %v1230_v13 = vld [vmem:[%s2227_s1 + $0x48] sm:$0xff] }
  0x9c   :  { %119 = vrot.lane.b32.xlu2 %v113_v15, %s1315_s17 }
  0xa3   :  { %285 = vperm.xlu0 %1311, %v1242_v16   ;;  %194 = vperm.xlu1 %1312, %v1237_v17  }
  0xa4   :  { %209 = vperm.xlu2 %1310, %v1238_v18   ;;  %v1231_v18 = vld [vmem:[%s2227_s1 + $0x50] sm:$0xff] }
  0xab   :  { %247 = vperm.xlu1 %1312, %v1240_v19   ;;  %v1232_v19 = vld [vmem:[%s2227_s1 + $0x58] sm:$0xff] }
  0xac   :  { %266 = vperm.xlu2 %1310, %v1241_v20  }
  0xee   :  { %v116_v21 = vpop.permute.xlu2 %115 }
  0xf6   :  { %v120_v24 = vpop.permute.xlu2 %119 }
  0xfe   :  { %v1511_v51 = vpop.permute.xlu2 %209 }
 0x105   :  { %v118_v22 = vpop.permute.xlu1 %117  ;;  %v122_v23 = vpop.permute.xlu0 %121 }
 0x106   :  { %v123_v25 = vsel %vm54_vm1, %v120_v24, %v122_v23  ;;  %v124_v26 = vsel %vm54_vm1, %v118_v22, %v120_v24  ;;  %v125_v27 = vsel %vm54_vm1, %v116_v21, %v118_v22  ;;  %v126_v35 = vsel %vm54_vm1, %v122_v23, %v116_v21  ;;  %v1513_v52 = vpop.permute.xlu2 %266 }
 0x107   :  { %v129_v28 = vmax.f32 %v113_v15, %v123_v25  ;;  %v127_v29 = vmax.f32 %v111_v6, %v125_v27  ;;  %v128_v30 = vmax.f32 %v112_v5, %v124_v26  ;;  %v130_v39 = vmax.f32 %v114_v4, %v126_v35 }
 0x10d   :  { %v136_v31 = vpop.permute.xlu1 %135  ;;  %v1515_v54 = vpop.permute.xlu0 %228 }
 0x10e   :  { %v138_v32 = vadd.f32 %v136_v31, %v127_v29  ;;  %v139_v33 = vadd.f32 %v136_v31, %v128_v30  ;;  %v140_v34 = vadd.f32 %v136_v31, %v129_v28  ;;  %v141_v40 = vadd.f32 %v136_v31, %v130_v39 }
 0x110   :  { %v1464_v36 = vmax.f32 %v138_v32, 0.0  ;;  %v1466_v37 = vmax.f32 %v139_v33, 0.0  ;;  %v1468_v38 = vmax.f32 %v140_v34, 0.0  ;;  %v1476_v42 = vmax.f32 %v141_v40, 0.0 }
 0x112   :  { %156 = vrot.lane.b32.xlu2 %v1464_v36, %s1316_s29  ;;  %158 = vrot.lane.b32.xlu0 %v1466_v37, %s1316_s29  ;;  %v288_v5 = vperm.slane %v1464_v36, 0  ;;  %v289_v6 = vperm.slane %v1466_v37, 0  ;;  %v290_v7 = vperm.slane %v1468_v38, 0  ;;  %v291_v8 = vperm.slane %v1476_v42, 0 }
 0x113   :  { %160 = vrot.lane.b32.xlu1 %v1468_v38, %s1316_s29  ;;  %v326_v10 = vperm.slane %v1464_v36, 2  ;;  %v327_v11 = vperm.slane %v1466_v37, 2  ;;  %v328_v15 = vperm.slane %v1468_v38, 2  ;;  %v329_v16 = vperm.slane %v1476_v42, 2 }
 0x114   :  { %v345_v20 = vperm.slane %v1464_v36, 3  ;;  %v348_v23 = vperm.slane %v1476_v42, 3  ;;  %v346_v24 = vperm.slane %v1466_v37, 3  ;;  %v347_v29 = vperm.slane %v1468_v38, 3 }
 0x115   :  { %v195_v55 = vpop.permute.xlu1 %194  ;;  %v1523_v62 = vpop.permute.xlu0 %285  ;;  %v307_v32 = vperm.slane %v1464_v36, 1  ;;  %v308_v39 = vperm.slane %v1466_v37, 1 }
 0x11a   :  { %162 = vrot.lane.b32.xlu2 %v1476_v42, %s1316_s29  ;;  %342 = vperm.xlu0 %1311, %v1245_v41  }
 0x11b   :  { %304 = vperm.xlu1 %1312, %v1243_v43  }
 0x11d   :  { %v1525_v63 = vpop.permute.xlu1 %247 }
 0x122   :  { %323 = vperm.xlu2 %1310, %v1244_v44   ;;  %173 = vrot.lane.b32.xlu0 %v1464_v36, %s1317_s9 }
 0x123   :  { %175 = vrot.lane.b32.xlu1 %v1466_v37, %s1317_s9 }
 0x12a   :  { %179 = vrot.lane.b32.xlu0 %v1476_v42, %s1317_s9  ;;  %177 = vrot.lane.b32.xlu2 %v1468_v38, %s1317_s9 }
 0x12b   :  { %361 = vperm.xlu1 %1312, %v1246_v45  }
 0x132   :  { %399 = vperm.xlu0 %1311, %v1248_v46   ;;  %380 = vperm.xlu2 %1310, %v1247_v47  }
 0x133   :  { %418 = vperm.xlu1 %1312, %v1249_v48  }
 0x13a   :  { %456 = vperm.xlu0 %1311, %v1251_v49   ;;  %437 = vperm.xlu2 %1310, %v1250_v50  }
 0x16c   :  { %v157_v53 = vpop.permute.xlu2 %156 }
 0x174   :  { %v163_v57 = vpop.permute.xlu2 %162 }
 0x175   :  { %v168_v58 = vsel %vm164_vm2, %v163_v57, %v157_v53 }
 0x176   :  { %v169_v59 = vmul.f32 %v1229_v56, %v168_v58 }
 0x178   :  { %v197_v60 = vperm.slane %v169_v59, 0  ;;  %v212_v61 = vperm.slane %v169_v59, 1  ;;  %v231_v3 = vperm.slane %v169_v59, 2  ;;  %v250_v9 = vperm.slane %v169_v59, 3 }
 0x179   :  { %v269_v14 = vperm.slane %v169_v59, 4 }
 0x17a   :  { %v201_v1 = vmul.f32 %v197_v60, %v195_v55  ;;  %v216_v2 = vmul.f32 %v212_v61, %v1511_v51  ;;  %v235_v0 = vmul.f32 %v231_v3, %v1515_v54  ;;  %v254_v33 = vmul.f32 %v250_v9, %v1525_v63 }
 0x17b   :  { %v273_v40 = vmul.f32 %v269_v14, %v1513_v52 }
 0x17c   :  { %v220_v4 = vadd.f32 %v216_v2, %v201_v1  ;;  %v1561_v50 = vpop.permute.xlu2 %323 }
 0x17e   :  { %v239_v25 = vadd.f32 %v235_v0, %v220_v4  ;;  %v310_v0 = vperm.slane %v1476_v42, 1 }
 0x180   :  { %v258_v45 = vadd.f32 %v254_v33, %v239_v25  ;;  %v292_v25 = vmul.f32 %v288_v5, %v1523_v62 }
 0x184   :  { %v159_v17 = vpop.permute.xlu0 %158 }
 0x185   :  { %v167_v21 = vsel %vm164_vm2, %v157_v53, %v159_v17  ;;  %v161_v22 = vpop.permute.xlu1 %160 }
 0x186   :  { %v170_v26 = vmul.f32 %v1230_v13, %v167_v21  ;;  %v165_v27 = vsel %vm164_vm2, %v161_v22, %v163_v57  ;;  %v166_v28 = vsel %vm164_vm2, %v159_v17, %v161_v22  ;;  %v277_v13 = vadd.f32 %v273_v40, %v258_v45 }
 0x187   :  { %v171_v30 = vmul.f32 %v1231_v18, %v166_v28  ;;  %v172_v31 = vmul.f32 %v1232_v19, %v165_v27  ;;  %v293_v45 = vmul.f32 %v289_v6, %v1523_v62  ;;  %v330_v6 = vmul.f32 %v326_v10, %v1561_v50 }
 0x188   :  { %v198_v34 = vperm.slane %v170_v26, 0  ;;  %v213_v35 = vperm.slane %v170_v26, 1  ;;  %v232_v48 = vperm.slane %v170_v26, 2  ;;  %v251_v59 = vperm.slane %v170_v26, 3 }
 0x189   :  { %v199_v41 = vperm.slane %v171_v30, 0  ;;  %v200_v43 = vperm.slane %v172_v31, 0  ;;  %v214_v44 = vperm.slane %v171_v30, 1  ;;  %v215_v49 = vperm.slane %v172_v31, 1 }
 0x18a   :  { %v202_v46 = vmul.f32 %v198_v34, %v195_v55  ;;  %v217_v47 = vmul.f32 %v213_v35, %v1511_v51  ;;  %v233_v58 = vperm.slane %v171_v30, 2  ;;  %v234_v61 = vperm.slane %v172_v31, 2 }
 0x18b   :  { %v203_v53 = vmul.f32 %v199_v41, %v195_v55  ;;  %v204_v56 = vmul.f32 %v200_v43, %v195_v55  ;;  %v218_v57 = vmul.f32 %v214_v44, %v1511_v51  ;;  %v219_v60 = vmul.f32 %v215_v49, %v1511_v51  ;;  %v178_v49 = vpop.permute.xlu2 %177 }
 0x18c   :  { %v252_v1 = vperm.slane %v171_v30, 3  ;;  %v1565_v2 = vpop.permute.xlu0 %342  ;;  %v270_v3 = vperm.slane %v170_v26, 4  ;;  %v253_v4 = vperm.slane %v172_v31, 3  ;;  %v236_v14 = vmul.f32 %v232_v48, %v1515_v54 }
 0x18d   :  { %v305_v9 = vpop.permute.xlu1 %304  ;;  %v237_v55 = vmul.f32 %v233_v58, %v1515_v54  ;;  %v271_v17 = vperm.slane %v171_v30, 4  ;;  %v272_v18 = vperm.slane %v172_v31, 4  ;;  %v238_v19 = vmul.f32 %v234_v61, %v1515_v54 }
 0x18e   :  { %v221_v21 = vadd.f32 %v217_v47, %v202_v46  ;;  %v222_v51 = vadd.f32 %v218_v57, %v203_v53  ;;  %v223_v22 = vadd.f32 %v219_v60, %v204_v56  ;;  %v256_v26 = vmul.f32 %v252_v1, %v1525_v63  ;;  %v1234_v1 = vld [vmem:[%s2227_s1 + $0x68] sm:$0xff] }
 0x18f   :  { %v255_v27 = vmul.f32 %v251_v59, %v1525_v63  ;;  %v257_v30 = vmul.f32 %v253_v4, %v1525_v63  ;;  %v274_v54 = vmul.f32 %v270_v3, %v1513_v52  ;;  %v275_v31 = vmul.f32 %v271_v17, %v1513_v52 }
 0x190   :  { %v240_v28 = vadd.f32 %v236_v14, %v221_v21  ;;  %v241_v33 = vadd.f32 %v237_v55, %v222_v51  ;;  %v242_v34 = vadd.f32 %v238_v19, %v223_v22  ;;  %v296_v35 = vadd.f32 %v292_v25, %v277_v13 }
 0x191   :  { %v311_v40 = vmul.f32 %v307_v32, %v305_v9  ;;  %v276_v44 = vmul.f32 %v272_v18, %v1513_v52  ;;  %v294_v46 = vmul.f32 %v290_v7, %v1523_v62  ;;  %v309_v63 = vperm.slane %v1468_v38, 1  ;;  %v1233_v7 = vld [vmem:[%s2227_s1 + $0x60] sm:$0xff] }
 0x192   :  { %v259_v41 = vadd.f32 %v255_v27, %v240_v28  ;;  %v260_v43 = vadd.f32 %v256_v26, %v241_v33  ;;  %v261_v5 = vadd.f32 %v257_v30, %v242_v34  ;;  %v295_v32 = vmul.f32 %v291_v8, %v1523_v62 }
 0x193   :  { %v315_v47 = vadd.f32 %v311_v40, %v296_v35  ;;  %v312_v58 = vmul.f32 %v308_v39, %v305_v9  ;;  %v364_v60 = vperm.slane %v1464_v36, 4  ;;  %v313_v61 = vmul.f32 %v309_v63, %v305_v9  ;;  %v1236_v36 = vld [vmem:[%s2227_s1 + $0x78] sm:$0xff] }
 0x194   :  { %v174_v48 = vpop.permute.xlu0 %173  ;;  %v278_v53 = vadd.f32 %v274_v54, %v259_v41  ;;  %v279_v56 = vadd.f32 %v275_v31, %v260_v43  ;;  %v280_v52 = vadd.f32 %v276_v44, %v261_v5  ;;  %v331_v39 = vmul.f32 %v327_v11, %v1561_v50 }
 0x195   :  { %v176_v57 = vpop.permute.xlu1 %175  ;;  %v334_v3 = vadd.f32 %v330_v6, %v315_v47  ;;  %v365_v4 = vperm.slane %v1466_v37, 4  ;;  %v367_v13 = vperm.slane %v1476_v42, 4  ;;  %v332_v19 = vmul.f32 %v328_v15, %v1561_v50  ;;  %v1235_v15 = vld [vmem:[%s2227_s1 + $0x70] sm:$0xff] }
 0x196   :  { %v184_v59 = vsel %vm181_vm3, %v174_v48, %v176_v57  ;;  %v297_v62 = vadd.f32 %v293_v45, %v278_v53  ;;  %v298_v8 = vadd.f32 %v294_v46, %v279_v56  ;;  %v183_v10 = vsel %vm181_vm3, %v176_v57, %v178_v49 }
 0x197   :  { %v299_v14 = vadd.f32 %v295_v32, %v280_v52  ;;  %v1610_v18 = vmul.f32 %v1233_v7, %v184_v59  ;;  %v349_v21 = vmul.f32 %v345_v20, %v1565_v2  ;;  %v1618_v51 = vmul.f32 %v1234_v1, %v183_v10 }
 0x198   :  { %v316_v55 = vadd.f32 %v312_v58, %v297_v62  ;;  %v317_v17 = vadd.f32 %v313_v61, %v298_v8  ;;  %v366_v11 = vperm.slane %v1468_v38, 4  ;;  %v333_v22 = vmul.f32 %v329_v16, %v1561_v50 }
 0x199   :  { %v350_v25 = vmul.f32 %v346_v24, %v1565_v2  ;;  %v314_v26 = vmul.f32 %v310_v0, %v305_v9  ;;  %v351_v20 = vmul.f32 %v347_v29, %v1565_v2  ;;  %v352_v16 = vmul.f32 %v348_v23, %v1565_v2  ;;  %v381_v23 = vpop.permute.xlu2 %380 }
 0x19a   :  { %v335_v27 = vadd.f32 %v331_v39, %v316_v55  ;;  %v336_v37 = vadd.f32 %v332_v19, %v317_v17  ;;  %v353_v50 = vadd.f32 %v349_v21, %v334_v3  ;;  %v383_v34 = vperm.slane %v1610_v18, 0 }
 0x19b   :  { %v318_v0 = vadd.f32 %v314_v26, %v299_v14  ;;  %v384_v42 = vperm.slane %v1618_v51, 0  ;;  %v440_v2 = vperm.slane %v1610_v18, 3  ;;  %v441_v40 = vperm.slane %v1618_v51, 3 }
 0x19c   :  { %v180_v24 = vpop.permute.xlu0 %179  ;;  %v354_v54 = vadd.f32 %v350_v25, %v335_v27  ;;  %v355_v41 = vadd.f32 %v351_v20, %v336_v37  ;;  %v387_v46 = vmul.f32 %v383_v34, %v381_v23  ;;  %v402_v63 = vperm.slane %v1610_v18, 1 }
 0x19d   :  { %v182_v9 = vsel %vm181_vm3, %v178_v49, %v180_v24  ;;  %v185_v28 = vsel %vm181_vm3, %v180_v24, %v174_v48  ;;  %v362_v33 = vpop.permute.xlu1 %361  ;;  %v337_v44 = vadd.f32 %v333_v22, %v318_v0  ;;  %v388_v32 = vmul.f32 %v384_v42, %v381_v23 }
 0x19e   :  { %v1644_v30 = vmul.f32 %v1235_v15, %v182_v9  ;;  %v1646_v38 = vmul.f32 %v1236_v36, %v185_v28  ;;  %v368_v29 = vmul.f32 %v364_v60, %v362_v33  ;;  %v369_v31 = vmul.f32 %v365_v4, %v362_v33 }
 0x19f   :  { %v370_v35 = vmul.f32 %v366_v11, %v362_v33  ;;  %v371_v53 = vmul.f32 %v367_v13, %v362_v33  ;;  %v403_v56 = vperm.slane %v1618_v51, 1  ;;  %v421_v57 = vperm.slane %v1610_v18, 2 }
 0x1a0   :  { %v372_v43 = vadd.f32 %v368_v29, %v353_v50  ;;  %v385_v5 = vperm.slane %v1644_v30, 0  ;;  %v373_v45 = vadd.f32 %v369_v31, %v354_v54  ;;  %v386_v48 = vperm.slane %v1646_v38, 0 }
 0x1a1   :  { %v374_v47 = vadd.f32 %v370_v35, %v355_v41  ;;  %v404_v52 = vperm.slane %v1644_v30, 1  ;;  %v422_v60 = vperm.slane %v1618_v51, 2  ;;  %v423_v10 = vperm.slane %v1644_v30, 2  ;;  %v438_v25 = vpop.permute.xlu2 %437 }
 0x1a2   :  { %v389_v49 = vmul.f32 %v385_v5, %v381_v23  ;;  %v391_v58 = vadd.f32 %v387_v46, %v372_v43  ;;  %v392_v7 = vadd.f32 %v388_v32, %v373_v45  ;;  %v356_v39 = vadd.f32 %v352_v16, %v337_v44  ;;  %v1262_v45 = vld [vmem:[%s2226_s2 + $0xf8] sm:$0xff]  ;;  %v1252_v46 = vld [vmem:[%s2226_s2 + $0x1e8] sm:$0xff]  ;;  %v1263_v32 = vld [vmem:[%s2226_s2 + $0x100] sm:$0xff] }
 0x1a3   :  { %v390_v3 = vmul.f32 %v386_v48, %v381_v23  ;;  %v405_v11 = vperm.slane %v1646_v38, 1  ;;  %v442_v22 = vperm.slane %v1644_v30, 3  ;;  %v444_v36 = vmul.f32 %v440_v2, %v438_v25  ;;  %v1261_v48 = vld [vmem:[%s2226_s2 + $0xf0] sm:$0xff] }
 0x1a4   :  { %v400_v6 = vpop.permute.xlu0 %399  ;;  %v393_v59 = vadd.f32 %v389_v49, %v374_v47  ;;  %v375_v21 = vadd.f32 %v371_v53, %v356_v39  ;;  %v445_v20 = vmul.f32 %v441_v40, %v438_v25  ;;  %v459_v24 = vperm.slane %v1610_v18, 4  ;;  %v1264_v49 = vld [vmem:[%s2226_s2 + $0x108] sm:$0xff]  ;;  %v1266_v53 = vld [vmem:[%s2226_s2 + $0x118] sm:$0xff] }
 0x1a5   :  { %v406_v62 = vmul.f32 %v402_v63, %v400_v6  ;;  %v407_v8 = vmul.f32 %v403_v56, %v400_v6  ;;  %v408_v61 = vmul.f32 %v404_v52, %v400_v6  ;;  %v419_v1 = vpop.permute.xlu1 %418  ;;  %v409_v16 = vmul.f32 %v405_v11, %v400_v6  ;;  %v1268_v11 = vld [vmem:[%s2226_s2 + $0x128] sm:$0xff] }
 0x1a6   :  { %v425_v4 = vmul.f32 %v421_v57, %v419_v1  ;;  %v426_v13 = vmul.f32 %v422_v60, %v419_v1  ;;  %v427_v19 = vmul.f32 %v423_v10, %v419_v1  ;;  %v394_v37 = vadd.f32 %v390_v3, %v375_v21 }
 0x1a7   :  { %v410_v14 = vadd.f32 %v406_v62, %v391_v58  ;;  %v411_v55 = vadd.f32 %v407_v8, %v392_v7  ;;  %v412_v17 = vadd.f32 %v408_v61, %v393_v59  ;;  %v460_v50 = vperm.slane %v1618_v51, 4 }
 0x1a8   :  { %v461_v0 = vperm.slane %v1644_v30, 4  ;;  %v446_v9 = vmul.f32 %v442_v22, %v438_v25  ;;  %v413_v31 = vadd.f32 %v409_v16, %v394_v37  ;;  %v424_v2 = vperm.slane %v1646_v38, 2  ;;  %v1267_v22 = vld [vmem:[%s2226_s2 + $0x120] sm:$0xff] }
 0x1a9   :  { %v429_v26 = vadd.f32 %v425_v4, %v410_v14  ;;  %v430_v27 = vadd.f32 %v426_v13, %v411_v55  ;;  %v431_v15 = vadd.f32 %v427_v19, %v412_v17  ;;  %v443_v18 = vperm.slane %v1646_v38, 3  ;;  %v1269_v17 = vld [vmem:[%s2226_s2 + $0x130] sm:$0xff] }
 0x1aa   :  { %v428_v43 = vmul.f32 %v424_v2, %v419_v1  ;;  %v462_v30 = vperm.slane %v1646_v38, 4  ;;  %v1265_v38 = vld [vmem:[%s2226_s2 + $0x110] sm:$0xff] }
 0x1ab   :  { %v449_v33 = vadd.f32 %v445_v20, %v430_v27  ;;  %v448_v34 = vadd.f32 %v444_v36, %v429_v26  ;;  %v450_v54 = vadd.f32 %v446_v9, %v431_v15  ;;  %v447_v44 = vmul.f32 %v443_v18, %v438_v25  ;;  %v1272_v25 = vld [vmem:[%s2226_s2 + $0x148] sm:$0xff]  ;;  %v1271_v26 = vld [vmem:[%s2226_s2 + $0x140] sm:$0xff]  ;;  %v1270_v27 = vld [vmem:[%s2226_s2 + $0x138] sm:$0xff] }
 0x1ac   :  { %v457_v28 = vpop.permute.xlu0 %456  ;;  %v432_v51 = vadd.f32 %v428_v43, %v413_v31  ;;  %v1275_v15 = vld [vmem:[%s2226_s2 + $0x160] sm:$0xff]  ;;  %v1274_v36 = vld [vmem:[%s2226_s2 + $0x158] sm:$0xff]  ;;  %v1273_v20 = vld [vmem:[%s2226_s2 + $0x150] sm:$0xff] }
 0x1ad   :  { %v463_v29 = vmul.f32 %v459_v24, %v457_v28  ;;  %v464_v42 = vmul.f32 %v460_v50, %v457_v28  ;;  %v465_v23 = vmul.f32 %v461_v0, %v457_v28  ;;  %v466_v5 = vmul.f32 %v462_v30, %v457_v28 }
 0x1ae   :  { %v451_v63 = vadd.f32 %v447_v44, %v432_v51 }
 0x1af   :  { %v469_v35 = vadd.f32 %v465_v23, %v450_v54  ;;  %v468_v40 = vadd.f32 %v464_v42, %v449_v33  ;;  %v467_v41 = vadd.f32 %v463_v29, %v448_v34  ;;  %v1255_v33 = vld [vmem:[%s2227_s1 + $0x90] sm:$0xff]  ;;  %v1254_v42 = vld [vmem:[%s2227_s1 + $0x88] sm:$0xff] }
 0x1b0   :  { %v470_v47 = vadd.f32 %v466_v5, %v451_v63 }
 0x1b1   :  { %475 = vrot.lane.b32.xlu0 %v469_v35, %s1317_s9  ;;  %473 = vrot.lane.b32.xlu2 %v468_v40, %s1317_s9 }
 0x1b2   :  { %471 = vrot.lane.b32.xlu1 %v467_v41, %s1317_s9 }
 0x1b9   :  { %565 = vperm.xlu0 %1311, %v1262_v45   ;;  %491 = vperm.xlu2 %1310, %v1252_v46  }
 0x1ba   :  { %477 = vrot.lane.b32.xlu1 %v470_v47, %s1317_s9 }
 0x1c1   :  { %622 = vperm.xlu0 %1311, %v1265_v38   ;;  %550 = vperm.xlu2 %1310, %v1261_v48  }
 0x1c2   :  { %584 = vperm.xlu1 %1312, %v1263_v32  }
 0x1c9   :  { %603 = vperm.xlu2 %1310, %v1264_v49  }
 0x1ca   :  { %641 = vperm.xlu1 %1312, %v1266_v53  }
 0x20b   :  { %v474_v56 = vpop.permute.xlu2 %473 }
 0x213   :  { %v492_v59 = vpop.permute.xlu2 %491 }
 0x21b   :  { %v1747_v37 = vpop.permute.xlu2 %550 }
 0x223   :  { %v476_v52 = vpop.permute.xlu0 %475  ;;  %v1753_v50 = vpop.permute.xlu2 %603 }
 0x224   :  { %v480_v57 = vsel %vm181_vm3, %v474_v56, %v476_v52  ;;  %v472_v6 = vpop.permute.xlu1 %471 }
 0x225   :  { %v484_v58 = vmax.f32 %v468_v40, %v480_v57  ;;  %v481_v7 = vsel %vm181_vm3, %v472_v6, %v474_v56 }
 0x226   :  { %v483_v60 = vmax.f32 %v467_v41, %v481_v7 }
 0x227   :  { %v495_v62 = vadd.f32 %v492_v59, %v484_v58 }
 0x228   :  { %v494_v8 = vadd.f32 %v492_v59, %v483_v60 }
 0x229   :  { %v1696_v61 = vmax.f32 %v495_v62, 0.0 }
 0x22a   :  { %v1698_v1 = vmax.f32 %v494_v8, 0.0 }
 0x22b   :  { %514 = vrot.lane.b32.xlu1 %v1696_v61, %s1318_s24  ;;  %v1751_v24 = vpop.permute.xlu0 %565  ;;  %v645_v34 = vperm.slane %v1696_v61, 0  ;;  %v664_v29 = vperm.slane %v1696_v61, 1  ;;  %v721_v54 = vperm.slane %v1696_v61, 4  ;;  %v702_v41 = vperm.slane %v1696_v61, 3 }
 0x22c   :  { %512 = vrot.lane.b32.xlu0 %v1698_v1, %s1318_s24  ;;  %v478_v10 = vpop.permute.xlu1 %477  ;;  %v644_v31 = vperm.slane %v1698_v1, 0  ;;  %v663_v2 = vperm.slane %v1698_v1, 1  ;;  %v720_v51 = vperm.slane %v1698_v1, 4  ;;  %v701_v30 = vperm.slane %v1698_v1, 3 }
 0x22d   :  { %v479_v39 = vsel %vm181_vm3, %v476_v52, %v478_v10  ;;  %v482_v3 = vsel %vm181_vm3, %v478_v10, %v472_v6  ;;  %v682_v45 = vperm.slane %v1698_v1, 2  ;;  %v683_v46 = vperm.slane %v1696_v61, 2 }
 0x22e   :  { %v485_v4 = vmax.f32 %v469_v35, %v479_v39  ;;  %v486_v13 = vmax.f32 %v470_v47, %v482_v3  ;;  %v1253_v3 = vld [vmem:[%s2227_s1 + $0x80] sm:$0xff] }
 0x230   :  { %v496_v14 = vadd.f32 %v492_v59, %v485_v4  ;;  %v497_v55 = vadd.f32 %v492_v59, %v486_v13  ;;  %v1256_v4 = vld [vmem:[%s2227_s1 + $0x98] sm:$0xff] }
 0x232   :  { %v1709_v19 = vmax.f32 %v496_v14, 0.0  ;;  %v1711_v21 = vmax.f32 %v497_v55, 0.0 }
 0x233   :  { %698 = vperm.xlu1 %1312, %v1269_v17   ;;  %v1757_v9 = vpop.permute.xlu0 %622 }
 0x234   :  { %518 = vrot.lane.b32.xlu0 %v1711_v21, %s1318_s24  ;;  %516 = vrot.lane.b32.xlu2 %v1709_v19, %s1318_s24  ;;  %v1749_v16 = vpop.permute.xlu1 %584  ;;  %v646_v5 = vperm.slane %v1709_v19, 0  ;;  %v647_v63 = vperm.slane %v1711_v21, 0  ;;  %v666_v47 = vperm.slane %v1711_v21, 1  ;;  %v665_v32 = vperm.slane %v1709_v19, 1 }
 0x235   :  { %v722_v56 = vperm.slane %v1709_v19, 4  ;;  %v703_v62 = vperm.slane %v1709_v19, 3  ;;  %v704_v8 = vperm.slane %v1711_v21, 3  ;;  %v684_v14 = vperm.slane %v1709_v19, 2 }
 0x236   :  { %v685_v55 = vperm.slane %v1711_v21, 2 }
 0x23b   :  { %529 = vrot.lane.b32.xlu1 %v1698_v1, %s1319_s30 }
 0x23c   :  { %679 = vperm.xlu0 %1311, %v1268_v11   ;;  %660 = vperm.xlu2 %1310, %v1267_v22   ;;  %v1755_v0 = vpop.permute.xlu1 %641 }
 0x23d   :  { %v1804_v10 = vmul.f32 %v644_v31, %v1755_v0  ;;  %v649_v17 = vmul.f32 %v645_v34, %v1755_v0  ;;  %v650_v11 = vmul.f32 %v646_v5, %v1755_v0 }
 0x243   :  { %535 = vrot.lane.b32.xlu1 %v1711_v21, %s1319_s30 }
 0x244   :  { %533 = vrot.lane.b32.xlu0 %v1709_v19, %s1319_s30  ;;  %531 = vrot.lane.b32.xlu2 %v1696_v61, %s1319_s30 }
 0x24b   :  { %755 = vperm.xlu1 %1312, %v1272_v25  }
 0x24c   :  { %736 = vperm.xlu0 %1311, %v1271_v26   ;;  %717 = vperm.xlu2 %1310, %v1270_v27  }
 0x253   :  { %812 = vperm.xlu1 %1312, %v1275_v15  }
 0x254   :  { %793 = vperm.xlu0 %1311, %v1274_v36   ;;  %774 = vperm.xlu2 %1310, %v1273_v20  }
 0x28e   :  { %v517_v28 = vpop.permute.xlu2 %516 }
 0x296   :  { %v1793_v52 = vpop.permute.xlu2 %660 }
 0x297   :  { %v1819_v22 = vmul.f32 %v664_v29, %v1793_v52 }
 0x29d   :  { %v515_v23 = vpop.permute.xlu1 %514 }
 0x29e   :  { %v513_v35 = vpop.permute.xlu0 %512  ;;  %v522_v40 = vsel %vm520_vm4, %v515_v23, %v517_v28 }
 0x29f   :  { %v523_v43 = vsel %vm520_vm4, %v513_v35, %v515_v23  ;;  %v1776_v18 = vmul.f32 %v1255_v33, %v522_v40 }
 0x2a0   :  { %v1781_v44 = vmul.f32 %v1254_v42, %v523_v43 }
 0x2a1   :  { %v555_v38 = vperm.slane %v1776_v18, 0  ;;  %v570_v48 = vperm.slane %v1776_v18, 1  ;;  %v589_v7 = vperm.slane %v1776_v18, 2  ;;  %v608_v34 = vperm.slane %v1776_v18, 3 }
 0x2a2   :  { %v554_v49 = vperm.slane %v1781_v44, 0  ;;  %v569_v53 = vperm.slane %v1781_v44, 1  ;;  %v588_v58 = vperm.slane %v1781_v44, 2  ;;  %v607_v33 = vperm.slane %v1781_v44, 3 }
 0x2a3   :  { %v559_v57 = vmul.f32 %v555_v38, %v1747_v37  ;;  %v574_v6 = vmul.f32 %v570_v48, %v1751_v24  ;;  %v593_v15 = vmul.f32 %v589_v7, %v1749_v16  ;;  %v626_v29 = vperm.slane %v1781_v44, 4 }
 0x2a4   :  { %v558_v59 = vmul.f32 %v554_v49, %v1747_v37  ;;  %v573_v60 = vmul.f32 %v569_v53, %v1751_v24  ;;  %v592_v27 = vmul.f32 %v588_v58, %v1749_v16  ;;  %v627_v31 = vperm.slane %v1776_v18, 4 }
 0x2a5   :  { %v578_v39 = vadd.f32 %v574_v6, %v559_v57  ;;  %v1812_v13 = vpop.permute.xlu1 %698  ;;  %v611_v18 = vmul.f32 %v607_v33, %v1753_v50 }
 0x2a6   :  { %v577_v25 = vadd.f32 %v573_v60, %v558_v59  ;;  %v519_v26 = vpop.permute.xlu0 %518  ;;  %v612_v59 = vmul.f32 %v608_v34, %v1753_v50 }
 0x2a7   :  { %v521_v36 = vsel %vm520_vm4, %v517_v28, %v519_v26  ;;  %v524_v20 = vsel %vm520_vm4, %v519_v26, %v513_v35  ;;  %v597_v43 = vadd.f32 %v593_v15, %v578_v39 }
 0x2a8   :  { %v525_v42 = vmul.f32 %v1253_v3, %v524_v20  ;;  %v528_v23 = vmul.f32 %v1256_v4, %v521_v36  ;;  %v596_v40 = vadd.f32 %v592_v27, %v577_v25  ;;  %v532_v4 = vpop.permute.xlu2 %531 }
 0x2a9   :  { %v616_v20 = vadd.f32 %v612_v59, %v597_v43 }
 0x2aa   :  { %v553_v5 = vperm.slane %v525_v42, 0  ;;  %v556_v38 = vperm.slane %v528_v23, 0  ;;  %v568_v48 = vperm.slane %v525_v42, 1  ;;  %v571_v49 = vperm.slane %v528_v23, 1 }
 0x2ab   :  { %v587_v28 = vperm.slane %v525_v42, 2  ;;  %v590_v53 = vperm.slane %v528_v23, 2  ;;  %v606_v57 = vperm.slane %v525_v42, 3  ;;  %v609_v35 = vperm.slane %v528_v23, 3 }
 0x2ac   :  { %v557_v6 = vmul.f32 %v553_v5, %v1747_v37  ;;  %v560_v58 = vmul.f32 %v556_v38, %v1747_v37  ;;  %v572_v7 = vmul.f32 %v568_v48, %v1751_v24  ;;  %v575_v44 = vmul.f32 %v571_v49, %v1751_v24 }
 0x2ad   :  { %v591_v60 = vmul.f32 %v587_v28, %v1749_v16  ;;  %v594_v39 = vmul.f32 %v590_v53, %v1749_v16  ;;  %v530_v3 = vpop.permute.xlu1 %529  ;;  %v625_v27 = vperm.slane %v525_v42, 4  ;;  %v628_v15 = vperm.slane %v528_v23, 4 }
 0x2ae   :  { %v576_v25 = vadd.f32 %v572_v7, %v557_v6  ;;  %v579_v26 = vadd.f32 %v575_v44, %v560_v58  ;;  %v680_v36 = vpop.permute.xlu0 %679  ;;  %v615_v37 = vadd.f32 %v611_v18, %v596_v40  ;;  %v630_v5 = vmul.f32 %v626_v29, %v1757_v9  ;;  %v1257_v58 = vld [vmem:[%s2227_s1 + $0xa0] sm:$0xff] }
 0x2af   :  { %v631_v24 = vmul.f32 %v627_v31, %v1757_v9  ;;  %v610_v33 = vmul.f32 %v606_v57, %v1753_v50  ;;  %v613_v34 = vmul.f32 %v609_v35, %v1753_v50  ;;  %v669_v16 = vmul.f32 %v665_v32, %v1793_v52 }
 0x2b0   :  { %v595_v38 = vadd.f32 %v591_v60, %v576_v25  ;;  %v598_v48 = vadd.f32 %v594_v39, %v579_v26  ;;  %v634_v49 = vadd.f32 %v630_v5, %v615_v37  ;;  %v629_v23 = vmul.f32 %v625_v27, %v1757_v9  ;;  %v718_v18 = vpop.permute.xlu2 %717 }
 0x2b1   :  { %v635_v42 = vadd.f32 %v631_v24, %v616_v20  ;;  %v632_v31 = vmul.f32 %v628_v15, %v1757_v9  ;;  %v687_v50 = vmul.f32 %v683_v46, %v680_v36  ;;  %v688_v53 = vmul.f32 %v684_v14, %v680_v36 }
 0x2b2   :  { %v614_v40 = vadd.f32 %v610_v33, %v595_v38  ;;  %v617_v29 = vadd.f32 %v613_v34, %v598_v48  ;;  %v653_v43 = vadd.f32 %v649_v17, %v634_v49  ;;  %v651_v32 = vmul.f32 %v647_v63, %v1755_v0 }
 0x2b3   :  { %v654_v28 = vadd.f32 %v650_v11, %v635_v42  ;;  %v667_v57 = vmul.f32 %v663_v2, %v1793_v52  ;;  %v670_v9 = vmul.f32 %v666_v47, %v1793_v52  ;;  %v706_v17 = vmul.f32 %v702_v41, %v1812_v13  ;;  %v1258_v41 = vld [vmem:[%s2227_s1 + $0xa8] sm:$0xff] }
 0x2b4   :  { %v633_v35 = vadd.f32 %v629_v23, %v614_v40  ;;  %v636_v6 = vadd.f32 %v632_v31, %v617_v29  ;;  %v672_v46 = vadd.f32 %v1819_v22, %v653_v43  ;;  %v707_v0 = vmul.f32 %v703_v62, %v1812_v13  ;;  %v1259_v22 = vld [vmem:[%s2227_s1 + $0xb0] sm:$0xff] }
 0x2b5   :  { %v673_v14 = vadd.f32 %v669_v16, %v654_v28  ;;  %v536_v11 = vpop.permute.xlu1 %535  ;;  %v540_v47 = vsel %vm537_vm5, %v530_v3, %v532_v4  ;;  %v686_v39 = vmul.f32 %v682_v45, %v680_v36  ;;  %v689_v25 = vmul.f32 %v685_v55, %v680_v36 }
 0x2b6   :  { %v652_v2 = vadd.f32 %v1804_v10, %v633_v35  ;;  %v655_v63 = vadd.f32 %v651_v32, %v636_v6  ;;  %v534_v52 = vpop.permute.xlu0 %533  ;;  %v691_v62 = vadd.f32 %v687_v50, %v672_v46  ;;  %v1887_v26 = vmul.f32 %v1257_v58, %v540_v47 }
 0x2b7   :  { %v692_v7 = vadd.f32 %v688_v53, %v673_v14  ;;  %v539_v10 = vsel %vm537_vm5, %v532_v4, %v534_v52  ;;  %v538_v44 = vsel %vm537_vm5, %v534_v52, %v536_v11  ;;  %v1260_v4 = vld [vmem:[%s2227_s1 + $0xb8] sm:$0xff]  ;;  %v541_v15 = vsel %vm537_vm5, %v536_v11, %v530_v3 }
 0x2b8   :  { %v671_v59 = vadd.f32 %v667_v57, %v652_v2  ;;  %v674_v60 = vadd.f32 %v670_v9, %v655_v63  ;;  %v1889_v27 = vmul.f32 %v1258_v41, %v539_v10  ;;  %v1896_v37 = vmul.f32 %v1259_v22, %v538_v44  ;;  %v775_v58 = vpop.permute.xlu2 %774 }
 0x2b9   :  { %v705_v45 = vmul.f32 %v701_v30, %v1812_v13  ;;  %v710_v5 = vadd.f32 %v706_v17, %v691_v62  ;;  %v711_v55 = vadd.f32 %v707_v0, %v692_v7  ;;  %v723_v36 = vperm.slane %v1711_v21, 4 }
 0x2ba   :  { %v690_v20 = vadd.f32 %v686_v39, %v671_v59  ;;  %v724_v24 = vmul.f32 %v720_v51, %v718_v18  ;;  %v725_v33 = vmul.f32 %v721_v54, %v718_v18  ;;  %v693_v34 = vadd.f32 %v689_v25, %v674_v60 }
 0x2bb   :  { %v726_v3 = vmul.f32 %v722_v56, %v718_v18  ;;  %v708_v38 = vmul.f32 %v704_v8, %v1812_v13  ;;  %v1911_v48 = vmul.f32 %v1260_v4, %v541_v15  ;;  %v739_v16 = vperm.slane %v1887_v26, 0 }
 0x2bc   :  { %v709_v30 = vadd.f32 %v705_v45, %v690_v20  ;;  %v740_v49 = vperm.slane %v1889_v27, 0  ;;  %v741_v1 = vperm.slane %v1896_v37, 0  ;;  %v758_v61 = vperm.slane %v1887_v26, 1 }
 0x2bd   :  { %v756_v54 = vpop.permute.xlu1 %755  ;;  %v729_v19 = vadd.f32 %v725_v33, %v710_v5  ;;  %v730_v56 = vadd.f32 %v726_v3, %v711_v55  ;;  %v759_v23 = vperm.slane %v1889_v27, 1  ;;  %v712_v21 = vadd.f32 %v708_v38, %v693_v34 }
 0x2be   :  { %v737_v51 = vpop.permute.xlu0 %736  ;;  %v728_v42 = vadd.f32 %v724_v24, %v709_v30  ;;  %v727_v29 = vmul.f32 %v723_v36, %v718_v18  ;;  %v742_v31 = vperm.slane %v1911_v48, 0  ;;  %v760_v43 = vperm.slane %v1896_v37, 1 }
 0x2bf   :  { %v743_v8 = vmul.f32 %v739_v16, %v737_v51  ;;  %v744_v13 = vmul.f32 %v740_v49, %v737_v51  ;;  %v745_v40 = vmul.f32 %v741_v1, %v737_v51  ;;  %v762_v28 = vmul.f32 %v758_v61, %v756_v54 }
 0x2c0   :  { %v763_v57 = vmul.f32 %v759_v23, %v756_v54  ;;  %v764_v35 = vmul.f32 %v760_v43, %v756_v54  ;;  %v779_v6 = vperm.slane %v1896_v37, 2  ;;  %v778_v9 = vperm.slane %v1889_v27, 2  ;;  %v1276_v23 = vld [vmem:[%s2226_s2 + $0x1f0] sm:$0xff] }
 0x2c1   :  { %v747_v50 = vadd.f32 %v743_v8, %v728_v42  ;;  %v748_v53 = vadd.f32 %v744_v13, %v729_v19  ;;  %v749_v32 = vadd.f32 %v745_v40, %v730_v56  ;;  %v777_v17 = vperm.slane %v1887_v26, 2  ;;  %v1285_v56 = vld [vmem:[%s2226_s2 + $0x168] sm:$0xff]  ;;  %v1288_v8 = vld [vmem:[%s2226_s2 + $0x180] sm:$0xff]  ;;  %v1286_v13 = vld [vmem:[%s2226_s2 + $0x170] sm:$0xff] }
 0x2c2   :  { %v731_v46 = vadd.f32 %v727_v29, %v712_v21  ;;  %v746_v14 = vmul.f32 %v742_v31, %v737_v51  ;;  %v796_v63 = vperm.slane %v1887_v26, 3  ;;  %v761_v47 = vperm.slane %v1911_v48, 1  ;;  %v1290_v40 = vld [vmem:[%s2226_s2 + $0x190] sm:$0xff]  ;;  %v1289_v29 = vld [vmem:[%s2226_s2 + $0x188] sm:$0xff] }
 0x2c3   :  { %v766_v11 = vadd.f32 %v762_v28, %v747_v50  ;;  %v767_v0 = vadd.f32 %v763_v57, %v748_v53  ;;  %v768_v2 = vadd.f32 %v764_v35, %v749_v32  ;;  %v797_v41 = vperm.slane %v1889_v27, 3 }
 0x2c4   :  { %v798_v52 = vperm.slane %v1896_v37, 3  ;;  %v815_v22 = vperm.slane %v1887_v26, 4  ;;  %v816_v7 = vperm.slane %v1889_v27, 4  ;;  %v783_v44 = vmul.f32 %v779_v6, %v775_v58 }
 0x2c5   :  { %v813_v10 = vpop.permute.xlu1 %812  ;;  %v782_v18 = vmul.f32 %v778_v9, %v775_v58  ;;  %v781_v59 = vmul.f32 %v777_v17, %v775_v58  ;;  %v750_v60 = vadd.f32 %v746_v14, %v731_v46  ;;  %v817_v15 = vperm.slane %v1896_v37, 4 }
 0x2c6   :  { %v794_v62 = vpop.permute.xlu0 %793  ;;  %v787_v45 = vadd.f32 %v783_v44, %v768_v2  ;;  %v765_v55 = vmul.f32 %v761_v47, %v756_v54  ;;  %v819_v36 = vmul.f32 %v815_v22, %v813_v10  ;;  %v820_v24 = vmul.f32 %v816_v7, %v813_v10  ;;  %v1291_v7 = vld [vmem:[%s2226_s2 + $0x198] sm:$0xff]  ;;  %v1296_v44 = vld [vmem:[%s2226_s2 + $0x1c0] sm:$0xff] }
 0x2c7   :  { %v800_v39 = vmul.f32 %v796_v63, %v794_v62  ;;  %v801_v25 = vmul.f32 %v797_v41, %v794_v62  ;;  %v802_v4 = vmul.f32 %v798_v52, %v794_v62  ;;  %v786_v20 = vadd.f32 %v782_v18, %v767_v0  ;;  %v1292_v52 = vld [vmem:[%s2226_s2 + $0x1a0] sm:$0xff]  ;;  %v1295_v18 = vld [vmem:[%s2226_s2 + $0x1b8] sm:$0xff] }
 0x2c8   :  { %v785_v5 = vadd.f32 %v781_v59, %v766_v11  ;;  %v780_v26 = vperm.slane %v1911_v48, 2  ;;  %v821_v33 = vmul.f32 %v817_v15, %v813_v10  ;;  %v769_v38 = vadd.f32 %v765_v55, %v750_v60  ;;  %v1297_v59 = vld [vmem:[%s2226_s2 + $0x1c8] sm:$0xff]  ;;  %v1299_v60 = vld [vmem:[%s2226_s2 + $0x1d8] sm:$0xff] }
 0x2c9   :  { %v806_v27 = vadd.f32 %v802_v4, %v787_v45  ;;  %v805_v34 = vadd.f32 %v801_v25, %v786_v20  ;;  %v799_v30 = vperm.slane %v1911_v48, 3  ;;  %v818_v51 = vperm.slane %v1911_v48, 4  ;;  %v1287_v48 = vld [vmem:[%s2226_s2 + $0x178] sm:$0xff] }
 0x2ca   :  { %v804_v3 = vadd.f32 %v800_v39, %v785_v5  ;;  %v784_v37 = vmul.f32 %v780_v26, %v775_v58  ;;  %v1298_v39 = vld [vmem:[%s2226_s2 + $0x1d0] sm:$0xff] }
 0x2cb   :  { %v825_v16 = vadd.f32 %v821_v33, %v806_v27  ;;  %v824_v49 = vadd.f32 %v820_v24, %v805_v34  ;;  %v803_v61 = vmul.f32 %v799_v30, %v794_v62  ;;  %v822_v19 = vmul.f32 %v818_v51, %v813_v10  ;;  %v1293_v62 = vld [vmem:[%s2226_s2 + $0x1a8] sm:$0xff]  ;;  %v1294_v10 = vld [vmem:[%s2226_s2 + $0x1b0] sm:$0xff] }
 0x2cc   :  { %v823_v1 = vadd.f32 %v819_v36, %v804_v3  ;;  %v788_v54 = vadd.f32 %v784_v37, %v769_v38  ;;  %v1278_v3 = vld [vmem:[%s2227_s1 + $0xc8] sm:$0xff] }
 0x2cd   :  { %831 = vrot.lane.b32.xlu1 %v825_v16, %s1319_s30  ;;  %829 = vrot.lane.b32.xlu0 %v824_v49, %s1319_s30 }
 0x2ce   :  { %827 = vrot.lane.b32.xlu2 %v823_v1, %s1319_s30  ;;  %v807_v42 = vadd.f32 %v803_v61, %v788_v54  ;;  %v1279_v61 = vld [vmem:[%s2227_s1 + $0xd0] sm:$0xff] }
 0x2d0   :  { %v826_v21 = vadd.f32 %v822_v19, %v807_v42 }
 0x2d5   :  { %906 = vperm.xlu1 %1312, %v1285_v56   ;;  %847 = vperm.xlu0 %1311, %v1276_v23  }
 0x2d6   :  { %833 = vrot.lane.b32.xlu2 %v826_v21, %s1319_s30 }
 0x2dd   :  { %959 = vperm.xlu1 %1312, %v1288_v8   ;;  %940 = vperm.xlu0 %1311, %v1287_v48  }
 0x2de   :  { %921 = vperm.xlu2 %1310, %v1286_v13  }
 0x2e5   :  { %997 = vperm.xlu0 %1311, %v1290_v40  }
 0x2e6   :  { %978 = vperm.xlu2 %1310, %v1289_v29  }
 0x328   :  { %v828_v31 = vpop.permute.xlu2 %827 }
 0x330   :  { %v834_v50 = vpop.permute.xlu2 %833 }
 0x331   :  { %v838_v0 = vsel %vm537_vm5, %v834_v50, %v828_v31 }
 0x332   :  { %v842_v47 = vmax.f32 %v826_v21, %v838_v0 }
 0x338   :  { %v2013_v25 = vpop.permute.xlu2 %921 }
 0x33f   :  { %v830_v43 = vpop.permute.xlu0 %829  ;;  %v832_v28 = vpop.permute.xlu1 %831 }
 0x340   :  { %v835_v53 = vsel %vm537_vm5, %v832_v28, %v834_v50  ;;  %v836_v32 = vsel %vm537_vm5, %v830_v43, %v832_v28  ;;  %v837_v57 = vsel %vm537_vm5, %v828_v31, %v830_v43  ;;  %v2015_v4 = vpop.permute.xlu2 %978 }
 0x341   :  { %v841_v35 = vmax.f32 %v825_v16, %v835_v53  ;;  %v839_v6 = vmax.f32 %v823_v1, %v837_v57  ;;  %v840_v9 = vmax.f32 %v824_v49, %v836_v32 }
 0x347   :  { %v848_v17 = vpop.permute.xlu0 %847  ;;  %v2017_v15 = vpop.permute.xlu1 %906 }
 0x348   :  { %v850_v46 = vadd.f32 %v848_v17, %v839_v6  ;;  %v851_v14 = vadd.f32 %v848_v17, %v840_v9  ;;  %v852_v11 = vadd.f32 %v848_v17, %v841_v35  ;;  %v853_v41 = vadd.f32 %v848_v17, %v842_v47 }
 0x34a   :  { %v1966_v2 = vmax.f32 %v850_v46, 0.0  ;;  %v1968_v63 = vmax.f32 %v851_v14, 0.0  ;;  %v1970_v58 = vmax.f32 %v852_v11, 0.0  ;;  %v1978_v22 = vmax.f32 %v853_v41, 0.0 }
 0x34c   :  { %870 = vrot.lane.b32.xlu2 %v1968_v63, %s1320_s20  ;;  %868 = vrot.lane.b32.xlu1 %v1966_v2, %s1320_s20  ;;  %v1001_v24 = vperm.slane %v1968_v63, 0  ;;  %v1000_v26 = vperm.slane %v1966_v2, 0  ;;  %v1002_v33 = vperm.slane %v1970_v58, 0  ;;  %v1003_v27 = vperm.slane %v1978_v22, 0 }
 0x34d   :  { %872 = vrot.lane.b32.xlu0 %v1970_v58, %s1320_s20  ;;  %v1038_v34 = vperm.slane %v1966_v2, 2  ;;  %v1039_v38 = vperm.slane %v1968_v63, 2  ;;  %v1040_v30 = vperm.slane %v1970_v58, 2  ;;  %v1041_v16 = vperm.slane %v1978_v22, 2 }
 0x34e   :  { %v1057_v49 = vperm.slane %v1966_v2, 3  ;;  %v1058_v37 = vperm.slane %v1968_v63, 3  ;;  %v1059_v54 = vperm.slane %v1970_v58, 3  ;;  %v1060_v51 = vperm.slane %v1978_v22, 3 }
 0x34f   :  { %v2019_v45 = vpop.permute.xlu0 %940  ;;  %v2021_v5 = vpop.permute.xlu1 %959  ;;  %v1019_v21 = vperm.slane %v1966_v2, 1  ;;  %v1020_v8 = vperm.slane %v1968_v63, 1  ;;  %v1021_v13 = vperm.slane %v1970_v58, 1  ;;  %v1022_v40 = vperm.slane %v1978_v22, 1 }
 0x350   :  { %v1076_v29 = vperm.slane %v1966_v2, 4  ;;  %v1077_v50 = vperm.slane %v1968_v63, 4  ;;  %v1079_v35 = vperm.slane %v1978_v22, 4  ;;  %v1078_v14 = vperm.slane %v1970_v58, 4 }
 0x354   :  { %1035 = vperm.xlu2 %1310, %v1292_v52   ;;  %874 = vrot.lane.b32.xlu1 %v1978_v22, %s1320_s20  ;;  %v1277_v52 = vld [vmem:[%s2227_s1 + $0xc0] sm:$0xff] }
 0x355   :  { %887 = vrot.lane.b32.xlu0 %v1968_v63, %s1321_s23 }
 0x357   :  { %v2023_v55 = vpop.permute.xlu0 %997 }
 0x358   :  { %v2063_v6 = vmul.f32 %v1000_v26, %v2023_v55  ;;  %v2071_v11 = vmul.f32 %v1001_v24, %v2023_v55 }
 0x35c   :  { %1054 = vperm.xlu2 %1310, %v1293_v62   ;;  %1016 = vperm.xlu1 %1312, %v1291_v7   ;;  %v1280_v62 = vld [vmem:[%s2227_s1 + $0xd8] sm:$0xff]  ;;  %v1006_v7 = vmul.f32 %v1002_v33, %v2023_v55 }
 0x35d   :  { %889 = vrot.lane.b32.xlu0 %v1970_v58, %s1321_s23 }
 0x364   :  { %885 = vrot.lane.b32.xlu2 %v1966_v2, %s1321_s23  ;;  %891 = vrot.lane.b32.xlu1 %v1978_v22, %s1321_s23 }
 0x365   :  { %1073 = vperm.xlu0 %1311, %v1294_v10  }
 0x36c   :  { %1111 = vperm.xlu2 %1310, %v1296_v44   ;;  %1092 = vperm.xlu1 %1312, %v1295_v18  }
 0x36d   :  { %1130 = vperm.xlu0 %1311, %v1297_v59  }
 0x374   :  { %1168 = vperm.xlu2 %1310, %v1299_v60   ;;  %1149 = vperm.xlu1 %1312, %v1298_v39  }
 0x3a6   :  { %v871_v20 = vpop.permute.xlu2 %870 }
 0x3ae   :  { %v2025_v36 = vpop.permute.xlu2 %1035 }
 0x3b6   :  { %v2065_v9 = vpop.permute.xlu2 %1054 }
 0x3be   :  { %v869_v1 = vpop.permute.xlu1 %868 }
 0x3bf   :  { %v879_v42 = vsel %vm876_vm6, %v869_v1, %v871_v20  ;;  %v873_v19 = vpop.permute.xlu0 %872 }
 0x3c0   :  { %v882_v56 = vmul.f32 %v1278_v3, %v879_v42  ;;  %v878_v23 = vsel %vm876_vm6, %v871_v20, %v873_v19 }
 0x3c1   :  { %v2052_v48 = vmul.f32 %v1279_v61, %v878_v23 }
 0x3c2   :  { %v910_v31 = vperm.slane %v882_v56, 0  ;;  %v925_v43 = vperm.slane %v882_v56, 1  ;;  %v944_v28 = vperm.slane %v882_v56, 2  ;;  %v963_v0 = vperm.slane %v882_v56, 3 }
 0x3c3   :  { %v911_v53 = vperm.slane %v2052_v48, 0  ;;  %v926_v32 = vperm.slane %v2052_v48, 1  ;;  %v945_v57 = vperm.slane %v2052_v48, 2  ;;  %v982_v26 = vperm.slane %v882_v56, 4 }
 0x3c4   :  { %v914_v17 = vmul.f32 %v910_v31, %v2017_v15  ;;  %v929_v46 = vmul.f32 %v925_v43, %v2013_v25  ;;  %v948_v10 = vmul.f32 %v944_v28, %v2019_v45  ;;  %v964_v3 = vperm.slane %v2052_v48, 3 }
 0x3c5   :  { %v915_v47 = vmul.f32 %v911_v53, %v2017_v15  ;;  %v930_v41 = vmul.f32 %v926_v32, %v2013_v25  ;;  %v949_v59 = vmul.f32 %v945_v57, %v2019_v45  ;;  %v983_v42 = vperm.slane %v2052_v48, 4 }
 0x3c6   :  { %v875_v44 = vpop.permute.xlu1 %874  ;;  %v933_v18 = vadd.f32 %v929_v46, %v914_v17  ;;  %v967_v43 = vmul.f32 %v963_v0, %v2021_v5  ;;  %v968_v0 = vmul.f32 %v964_v3, %v2021_v5 }
 0x3c7   :  { %v877_v60 = vsel %vm876_vm6, %v873_v19, %v875_v44  ;;  %v880_v39 = vsel %vm876_vm6, %v875_v44, %v869_v1  ;;  %v888_v20 = vpop.permute.xlu0 %887  ;;  %v934_v24 = vadd.f32 %v930_v41, %v915_v47  ;;  %v886_v44 = vpop.permute.xlu2 %885 }
 0x3c8   :  { %v881_v33 = vmul.f32 %v1277_v52, %v880_v39  ;;  %v884_v61 = vmul.f32 %v1280_v62, %v877_v60  ;;  %v952_v23 = vadd.f32 %v948_v10, %v933_v18  ;;  %v986_v10 = vmul.f32 %v982_v26, %v2015_v4 }
 0x3c9   :  { %v953_v31 = vadd.f32 %v949_v59, %v934_v24 }
 0x3ca   :  { %v909_v28 = vperm.slane %v881_v33, 0  ;;  %v912_v53 = vperm.slane %v884_v61, 0  ;;  %v924_v32 = vperm.slane %v881_v33, 1  ;;  %v927_v19 = vperm.slane %v884_v61, 1 }
 0x3cb   :  { %v943_v57 = vperm.slane %v881_v33, 2  ;;  %v946_v17 = vperm.slane %v884_v61, 2  ;;  %v962_v1 = vperm.slane %v881_v33, 3  ;;  %v965_v46 = vperm.slane %v884_v61, 3 }
 0x3cc   :  { %v913_v56 = vmul.f32 %v909_v28, %v2017_v15  ;;  %v916_v47 = vmul.f32 %v912_v53, %v2017_v15  ;;  %v928_v41 = vmul.f32 %v924_v32, %v2013_v25  ;;  %v931_v48 = vmul.f32 %v927_v19, %v2013_v25 }
 0x3cd   :  { %v947_v52 = vmul.f32 %v943_v57, %v2019_v45  ;;  %v981_v62 = vperm.slane %v881_v33, 4  ;;  %v950_v18 = vmul.f32 %v946_v17, %v2019_v45  ;;  %v984_v59 = vperm.slane %v884_v61, 4 }
 0x3ce   :  { %v1017_v60 = vpop.permute.xlu1 %1016  ;;  %v932_v39 = vadd.f32 %v928_v41, %v913_v56  ;;  %v935_v24 = vadd.f32 %v931_v48, %v916_v47  ;;  %v896_v15 = vsel %vm893_vm7, %v886_v44, %v888_v20  ;;  %v971_v28 = vadd.f32 %v967_v43, %v952_v23  ;;  %v1281_v23 = vld [vmem:[%s2227_s1 + $0xe0] sm:$0xff] }
 0x3cf   :  { %v972_v53 = vadd.f32 %v968_v0, %v953_v31  ;;  %v987_v25 = vmul.f32 %v983_v42, %v2015_v4  ;;  %v890_v32 = vpop.permute.xlu0 %889  ;;  %v966_v33 = vmul.f32 %v962_v1, %v2021_v5  ;;  %v969_v26 = vmul.f32 %v965_v46, %v2021_v5 }
 0x3d0   :  { %v951_v3 = vadd.f32 %v947_v52, %v932_v39  ;;  %v954_v19 = vadd.f32 %v950_v18, %v935_v24  ;;  %v985_v45 = vmul.f32 %v981_v62, %v2015_v4  ;;  %v990_v61 = vadd.f32 %v986_v10, %v971_v28  ;;  %v1284_v39 = vld [vmem:[%s2227_s1 + $0xf8] sm:$0xff] }
 0x3d1   :  { %v991_v57 = vadd.f32 %v987_v25, %v972_v53  ;;  %v1024_v17 = vmul.f32 %v1020_v8, %v1017_v60  ;;  %v988_v43 = vmul.f32 %v984_v59, %v2015_v4  ;;  %v1025_v1 = vmul.f32 %v1021_v13, %v1017_v60  ;;  %v1282_v13 = vld [vmem:[%s2227_s1 + $0xe8] sm:$0xff] }
 0x3d2   :  { %v970_v31 = vadd.f32 %v966_v33, %v951_v3  ;;  %v973_v42 = vadd.f32 %v969_v26, %v954_v19  ;;  %v1007_v5 = vmul.f32 %v1003_v27, %v2023_v55  ;;  %v1042_v46 = vmul.f32 %v1038_v34, %v2025_v36  ;;  %v1112_v33 = vpop.permute.xlu2 %1111 }
 0x3d3   :  { %v1009_v8 = vadd.f32 %v2071_v11, %v990_v61  ;;  %v1010_v56 = vadd.f32 %v1006_v7, %v991_v57  ;;  %v1043_v47 = vmul.f32 %v1039_v38, %v2025_v36  ;;  %v895_v55 = vsel %vm893_vm7, %v888_v20, %v890_v32  ;;  %v1283_v20 = vld [vmem:[%s2227_s1 + $0xf0] sm:$0xff] }
 0x3d4   :  { %v989_v41 = vadd.f32 %v985_v45, %v970_v31  ;;  %v992_v4 = vadd.f32 %v988_v43, %v973_v42  ;;  %v1044_v27 = vmul.f32 %v1040_v30, %v2025_v36  ;;  %v2132_v34 = vmul.f32 %v1281_v23, %v896_v15 }
 0x3d5   :  { %v1028_v11 = vadd.f32 %v1024_v17, %v1009_v8  ;;  %v1029_v7 = vadd.f32 %v1025_v1, %v1010_v56  ;;  %v1023_v52 = vmul.f32 %v1019_v21, %v1017_v60  ;;  %v1026_v62 = vmul.f32 %v1022_v40, %v1017_v60 }
 0x3d6   :  { %v1008_v48 = vadd.f32 %v2063_v6, %v989_v41  ;;  %v1011_v38 = vadd.f32 %v1007_v5, %v992_v4  ;;  %v892_v0 = vpop.permute.xlu1 %891  ;;  %v1045_v30 = vmul.f32 %v1041_v16, %v2025_v36  ;;  %v1061_v6 = vmul.f32 %v1057_v49, %v2065_v9 }
 0x3d7   :  { %v2148_v10 = vmul.f32 %v1282_v13, %v895_v55  ;;  %v894_v21 = vsel %vm893_vm7, %v890_v32, %v892_v0  ;;  %v1074_v18 = vpop.permute.xlu0 %1073  ;;  %v1047_v60 = vadd.f32 %v1043_v47, %v1028_v11  ;;  %v897_v36 = vsel %vm893_vm7, %v892_v0, %v886_v44 }
 0x3d8   :  { %v1027_v40 = vadd.f32 %v1023_v52, %v1008_v48  ;;  %v1030_v59 = vadd.f32 %v1026_v62, %v1011_v38  ;;  %v1062_v16 = vmul.f32 %v1058_v37, %v2065_v9  ;;  %v1063_v49 = vmul.f32 %v1059_v54, %v2065_v9 }
 0x3d9   :  { %v1048_v24 = vadd.f32 %v1044_v27, %v1029_v7  ;;  %v2163_v15 = vmul.f32 %v1283_v20, %v894_v21  ;;  %v1114_v28 = vperm.slane %v2132_v34, 1  ;;  %v1081_v32 = vmul.f32 %v1077_v50, %v1074_v18 }
 0x3da   :  { %v1046_v53 = vadd.f32 %v1042_v46, %v1027_v40  ;;  %v1049_v25 = vadd.f32 %v1045_v30, %v1030_v59  ;;  %v1064_v44 = vmul.f32 %v1060_v51, %v2065_v9  ;;  %v2171_v37 = vmul.f32 %v1284_v39, %v897_v36  ;;  %v1169_v0 = vpop.permute.xlu2 %1168 }
 0x3db   :  { %v1082_v54 = vmul.f32 %v1078_v14, %v1074_v18  ;;  %v1095_v3 = vperm.slane %v2132_v34, 0  ;;  %v1066_v26 = vadd.f32 %v1062_v16, %v1047_v60  ;;  %v1080_v45 = vmul.f32 %v1076_v29, %v1074_v18 }
 0x3dc   :  { %v1065_v19 = vadd.f32 %v1061_v6, %v1046_v53  ;;  %v1115_v63 = vperm.slane %v2148_v10, 1  ;;  %v1067_v50 = vadd.f32 %v1063_v49, %v1048_v24  ;;  %v1096_v61 = vperm.slane %v2148_v10, 0 }
 0x3dd   :  { %v1097_v51 = vperm.slane %v2163_v15, 0  ;;  %v1116_v9 = vperm.slane %v2163_v15, 1  ;;  %v1118_v57 = vmul.f32 %v1114_v28, %v1112_v33  ;;  %v1068_v17 = vadd.f32 %v1064_v44, %v1049_v25 }
 0x3de   :  { %v1084_v58 = vadd.f32 %v1080_v45, %v1065_v19  ;;  %v1085_v14 = vadd.f32 %v1081_v32, %v1066_v26  ;;  %v1093_v23 = vpop.permute.xlu1 %1092  ;;  %v1086_v31 = vadd.f32 %v1082_v54, %v1067_v50  ;;  %v1083_v2 = vmul.f32 %v1079_v35, %v1074_v18 }
 0x3df   :  { %v1099_v42 = vmul.f32 %v1095_v3, %v1093_v23  ;;  %v1100_v43 = vmul.f32 %v1096_v61, %v1093_v23  ;;  %v1101_v1 = vmul.f32 %v1097_v51, %v1093_v23  ;;  %v1098_v29 = vperm.slane %v2171_v37, 0  ;;  %v1131_v41 = vpop.permute.xlu0 %1130 }
 0x3e0   :  { %v1119_v5 = vmul.f32 %v1115_v63, %v1112_v33  ;;  %v1133_v46 = vperm.slane %v2132_v34, 2  ;;  %v1120_v4 = vmul.f32 %v1116_v9, %v1112_v33  ;;  %v1087_v13 = vadd.f32 %v1083_v2, %v1068_v17 }
 0x3e1   :  { %v1103_v8 = vadd.f32 %v1099_v42, %v1084_v58  ;;  %v1104_v56 = vadd.f32 %v1100_v43, %v1085_v14  ;;  %v1105_v47 = vadd.f32 %v1101_v1, %v1086_v31  ;;  %v1102_v55 = vmul.f32 %v1098_v29, %v1093_v23 }
 0x3e2   :  { %v1134_v27 = vperm.slane %v2148_v10, 2  ;;  %v1135_v11 = vperm.slane %v2163_v15, 2  ;;  %v1172_v7 = vperm.slane %v2148_v10, 4  ;;  %v1117_v38 = vperm.slane %v2171_v37, 1 }
 0x3e3   :  { %v1122_v22 = vadd.f32 %v1118_v57, %v1103_v8  ;;  %v1123_v35 = vadd.f32 %v1119_v5, %v1104_v56  ;;  %v1124_v48 = vadd.f32 %v1120_v4, %v1105_v47  ;;  %v1137_v52 = vmul.f32 %v1133_v46, %v1131_v41  ;;  %v1300_v57 = vld [vmem:[%s2226_s2 + $0x1f8] sm:$0xff] }
 0x3e4   :  { %v1138_v62 = vmul.f32 %v1134_v27, %v1131_v41  ;;  %v1139_v20 = vmul.f32 %v1135_v11, %v1131_v41  ;;  %v1152_v30 = vperm.slane %v2132_v34, 3  ;;  %v1153_v6 = vperm.slane %v2148_v10, 3 }
 0x3e5   :  { %v1154_v21 = vperm.slane %v2163_v15, 3  ;;  %v1173_v18 = vperm.slane %v2163_v15, 4  ;;  %v1171_v40 = vperm.slane %v2132_v34, 4  ;;  %v1106_v59 = vadd.f32 %v1102_v55, %v1087_v13 }
 0x3e6   :  { %v1141_v60 = vadd.f32 %v1137_v52, %v1122_v22  ;;  %v1142_v39 = vadd.f32 %v1138_v62, %v1123_v35  ;;  %v1150_v36 = vpop.permute.xlu1 %1149  ;;  %v1143_v16 = vadd.f32 %v1139_v20, %v1124_v48  ;;  %v1176_v25 = vmul.f32 %v1172_v7, %v1169_v0 }
 0x3e7   :  { %v1156_v49 = vmul.f32 %v1152_v30, %v1150_v36  ;;  %v1157_v24 = vmul.f32 %v1153_v6, %v1150_v36  ;;  %v1158_v28 = vmul.f32 %v1154_v21, %v1150_v36  ;;  %v1175_v53 = vmul.f32 %v1171_v40, %v1169_v0 }
 0x3e8   :  { %v1121_v32 = vmul.f32 %v1117_v38, %v1112_v33  ;;  %v1177_v54 = vmul.f32 %v1173_v18, %v1169_v0  ;;  %v1136_v15 = vperm.slane %v2171_v37, 2  ;;  %v1155_v34 = vperm.slane %v2171_v37, 3 }
 0x3e9   :  { %v1162_v44 = vadd.f32 %v1158_v28, %v1143_v16  ;;  %v1161_v10 = vadd.f32 %v1157_v24, %v1142_v39  ;;  %v1160_v3 = vadd.f32 %v1156_v49, %v1141_v60  ;;  %v1174_v33 = vperm.slane %v2171_v37, 4 }
 0x3ea   :  { %v1125_v19 = vadd.f32 %v1121_v32, %v1106_v59  ;;  %v1140_v50 = vmul.f32 %v1136_v15, %v1131_v41  ;;  %v1159_v61 = vmul.f32 %v1155_v34, %v1150_v36 }
 0x3eb   :  { %v1181_v26 = vadd.f32 %v1177_v54, %v1162_v44  ;;  %v1180_v45 = vadd.f32 %v1176_v25, %v1161_v10  ;;  %v1179_v63 = vadd.f32 %v1175_v53, %v1160_v3  ;;  %v1178_v17 = vmul.f32 %v1174_v33, %v1169_v0 }
 0x3ec   :  { %v1144_v51 = vadd.f32 %v1140_v50, %v1125_v19 }
 0x3ed   :  { %1187 = vrot.lane.b32.xlu2 %v1181_v26, %s1321_s23  ;;  %1185 = vrot.lane.b32.xlu1 %v1180_v45, %s1321_s23 }
 0x3ee   :  { %1183 = vrot.lane.b32.xlu0 %v1179_v63, %s1321_s23  ;;  %v1163_v9 = vadd.f32 %v1159_v61, %v1144_v51 }
 0x3f0   :  { %v1182_v58 = vadd.f32 %v1178_v17, %v1163_v9 }
 0x3f5   :  { %1203 = vperm.xlu1 %1312, %v1300_v57  }
 0x3f6   :  { %1189 = vrot.lane.b32.xlu0 %v1182_v58, %s1321_s23 }
 0x447   :  { %v1188_v31 = vpop.permute.xlu2 %1187 }
 0x45f   :  { %v1186_v14 = vpop.permute.xlu1 %1185 }
 0x460   :  { %v1184_v23 = vpop.permute.xlu0 %1183  ;;  %v1192_v42 = vsel %vm893_vm7, %v1186_v14, %v1188_v31 }
 0x461   :  { %v1193_v43 = vsel %vm893_vm7, %v1184_v23, %v1186_v14  ;;  %v1196_v37 = vmax.f32 %v1180_v45, %v1192_v42 }
 0x462   :  { %v1195_v1 = vmax.f32 %v1179_v63, %v1193_v43 }
 0x467   :  { %v1204_v2 = vpop.permute.xlu1 %1203 }
 0x468   :  { %v1206_v29 = vadd.f32 %v1204_v2, %v1195_v1  ;;  %v1207_v5 = vadd.f32 %v1204_v2, %v1196_v37  ;;  %v1190_v46 = vpop.permute.xlu0 %1189 }
 0x469   :  { %v1191_v8 = vsel %vm893_vm7, %v1188_v31, %v1190_v46  ;;  %v1194_v56 = vsel %vm893_vm7, %v1190_v46, %v1184_v23 }
 0x46a   :  { %v1210_v47 = vmax.f32 %v1206_v29, 0.0  ;;  %v1211_v41 = vmax.f32 %v1207_v5, 0.0  ;;  %v1197_v4 = vmax.f32 %v1181_v26, %v1191_v8  ;;  %v1198_v13 = vmax.f32 %v1182_v58, %v1194_v56 }
 0x46c   :  { %1214 = vst [vmem:[%s2228_s3] sm:$0xff] %v1210_v47  ;;  %v1208_v55 = vadd.f32 %v1204_v2, %v1197_v4  ;;  %v1209_v27 = vadd.f32 %v1204_v2, %v1198_v13 }
 0x46d   :  { %1215 = vst [vmem:[%s2228_s3 + $0x8] sm:$0xff] %v1211_v41 }
 0x46e   :  { %v1212_v11 = vmax.f32 %v1208_v55, 0.0  ;;  %v1213_v7 = vmax.f32 %v1209_v27, 0.0 }
 0x470   :  { %1216 = vst [vmem:[%s2228_s3 + $0x10] sm:$0xff] %v1212_v11 }
 0x471   :  { %1217 = vst [vmem:[%s2228_s3 + $0x18] sm:$0xff] %v1213_v7 }

</bundles_post_ra>
